<compile_context>
chip_gen: v7x
topology: tpu7x:2x2x1
jax: 0.10.0
libtpu: 0.0.40
codegen_flags: <defaults>
</compile_context>

<pallas_src>
import jax
import jax.numpy as jnp
from jax.experimental import pallas as pl
from jax.experimental.pallas import tpu as pltpu

B = 8        # batch ("6000" in the hard-coded h_0; zeros either way)
T = 16       # sequence length
NHID = 32    # hidden size (fixed by h_0 shape (4, *, 32))
NCLASS = 4


def gat_kernel(xf_ref, xb_ref,                       # (T, B, 1) fwd-time / bwd-time input
               wih_f_ref, wih_b_ref, b_ref,          # (1, 8H) packed input weights / bias
               w_bd_ref,                             # (2H, 8H) block-diag recurrent weights
               w1_ref, b1_ref, w2_ref, b2_ref, w3_ref, b3_ref,
               out_ref,                              # (B, NCLASS)
               xc_ref):                              # scratch (T, B, 8H)
    T_ = xf_ref.shape[0]
    B_ = xf_ref.shape[1]
    H2 = w_bd_ref.shape[0]                           # 2H (fwd | bwd packed)

    # ---- one-time precompute, off the serial chain: Xc[t] = x_t*W_ih + b ----
    xc_ref[...] = (xf_ref[...] * wih_f_ref[...]
                   + xb_ref[...] * wih_b_ref[...]
                   + b_ref[...])

    # Hoist the packed recurrent weights out of the loop (stays resident).
    w_bd = w_bd_ref[...]

    h = jnp.zeros((B_, H2), jnp.float32)             # [h_fwd | h_bwd]
    c = jnp.zeros((B_, H2), jnp.float32)

    # Fully-unrolled fused recurrence (T=16 static): one lane-dense matmul and
    # a handful of full-width transcendentals per step, static slice indices.
    for k in range(T_):
        z = xc_ref[k] + jnp.dot(h, w_bd, preferred_element_type=jnp.float32)  # (B, 8H)
        sig = jax.nn.sigmoid(z)                       # packed sigmoid (i,f,o lanes used)
        i_g = sig[:, 0 * H2:1 * H2]
        f_g = sig[:, 1 * H2:2 * H2]
        o_g = sig[:, 3 * H2:4 * H2]
        g_g = jnp.tanh(z[:, 2 * H2:3 * H2])           # tanh only on the g slice
        c = f_g * c + i_g * g_g
        h = o_g * jnp.tanh(c)

    # MLP: the (h_fwd + h_bwd) sum is folded into w1 (rows stacked), so the
    # packed (B, 2H) hidden state feeds the first matmul directly.
    h1 = jnp.maximum(jnp.dot(h, w1_ref[...], preferred_element_type=jnp.float32)
                     + b1_ref[...], 0.0)
    h2 = jnp.maximum(jnp.dot(h1, w2_ref[...], preferred_element_type=jnp.float32)
                     + b2_ref[...], 0.0)
    logits = jnp.dot(h2, w3_ref[...], preferred_element_type=jnp.float32) + b3_ref[...]

    # log_softmax(dim=1)
    m = jnp.max(logits, axis=1, keepdims=True)
    zc = logits - m
    lse = jnp.log(jnp.sum(jnp.exp(zc), axis=1, keepdims=True))
    out_ref[...] = zc - lse


def pack_params(params):
    """Repack raw per-direction LSTM params into the fused lane layout."""
    (wih_f, whh_f, b_f, wih_b, whh_b, b_b, w1, b1, w2, b2, w3, b3) = params
    H = whh_f.shape[-1]
    zH = jnp.zeros((1, H), jnp.float32)
    zHH = jnp.zeros((H, H), jnp.float32)

    # Gate-major lane layout: per-gate 2H block = [fwd(H) | bwd(H)]; gates i,f,g,o.
    wih_f_pack = jnp.concatenate(
        [jnp.concatenate([wih_f[g], zH], axis=1) for g in range(4)], axis=1)      # (1, 8H)
    wih_b_pack = jnp.concatenate(
        [jnp.concatenate([zH, wih_b[g]], axis=1) for g in range(4)], axis=1)      # (1, 8H)
    b_pack = jnp.concatenate(
        [jnp.concatenate([b_f[g], b_b[g]], axis=1) for g in range(4)], axis=1)    # (1, 8H)

    # Block-diagonal recurrent matrix: rows [h_fwd | h_bwd] -> packed gates.
    w_bd = jnp.concatenate(
        [jnp.concatenate([jnp.concatenate([whh_f[g], zHH], axis=1),
                          jnp.concatenate([zHH, whh_b[g]], axis=1)], axis=0)
         for g in range(4)], axis=1)                                              # (2H, 8H)

    # Fold h_fwd + h_bwd into the first MLP layer.
    w1s = jnp.concatenate([w1, w1], axis=0)                                       # (2H, NHID)

    return (wih_f_pack, wih_b_pack, b_pack, w_bd, w1s, b1, w2, b2, w3, b3)


def gat_forward(x, params):
    """x: (B, T) float32.  Returns log-probs (B, NCLASS)."""
    packed = pack_params(params)
    x_tb = x.T                                       # (T, B): time on sublanes
    xf = x_tb[:, :, None]                            # (T, B, 1)
    xb = x_tb[::-1, :, None]                         # time-reversed for backward dir
    n_in = 2 + len(packed)
    return pl.pallas_call(
        gat_kernel,
        out_shape=jax.ShapeDtypeStruct((x.shape[0], NCLASS), jnp.float32),
        in_specs=[pl.BlockSpec(memory_space=pltpu.MemorySpace.VMEM)] * n_in,
        out_specs=pl.BlockSpec(memory_space=pltpu.MemorySpace.VMEM),
        scratch_shapes=[pltpu.VMEM((x.shape[1], x.shape[0], 8 * NHID), jnp.float32)],
    )(xf, xb, *packed)


def gat_reference(x, params):
    (wih_f, whh_f, b_f, wih_b, whh_b, b_b, w1, b1, w2, b2, w3, b3) = params
    x_tb = x.T

    def run_dir(wih, whh, b, reverse):
        ts = range(T - 1, -1, -1) if reverse else range(T)
        h = jnp.zeros((x.shape[0], NHID), jnp.float32)
        c = jnp.zeros((x.shape[0], NHID), jnp.float32)
        for t in ts:
            xt = x_tb[t][:, None]
            g = [xt * wih[k] + h @ whh[k] + b[k] for k in range(4)]
            i_g, f_g = jax.nn.sigmoid(g[0]), jax.nn.sigmoid(g[1])
            g_g, o_g = jnp.tanh(g[2]), jax.nn.sigmoid(g[3])
            c = f_g * c + i_g * g_g
            h = o_g * jnp.tanh(c)
        return h

    xh = run_dir(wih_f, whh_f, b_f, False) + run_dir(wih_b, whh_b, b_b, True)
    h1 = jnp.maximum(xh @ w1 + b1, 0.0)
    h2 = jnp.maximum(h1 @ w2 + b2, 0.0)
    logits = h2 @ w3 + b3
    return jax.nn.log_softmax(logits, axis=1)


def init_params(key):
    ks = jax.random.split(key, 12)
    s = 1.0 / jnp.sqrt(NHID)
    u = lambda k, shp: jax.random.uniform(k, shp, jnp.float32, -s, s)
    # LSTM layer 0, forward / reverse.  Gate order (i, f, g, o); weights stored
    # pre-transposed for right-multiplication; biases are (b_ih + b_hh).
    wih_f = u(ks[0], (4, 1, NHID))
    whh_f = u(ks[1], (4, NHID, NHID))
    b_f = u(ks[2], (4, 1, NHID))
    wih_b = u(ks[3], (4, 1, NHID))
    whh_b = u(ks[4], (4, NHID, NHID))
    b_b = u(ks[5], (4, 1, NHID))
    # MLP
    w1 = u(ks[6], (32, NHID));        b1 = u(ks[7], (1, NHID))
    w2 = u(ks[8], (NHID, NHID // 2)); b2 = u(ks[9], (1, NHID // 2))
    w3 = u(ks[10], (NHID // 2, NCLASS)); b3 = u(ks[11], (1, NCLASS))
    return (wih_f, whh_f, b_f, wih_b, whh_b, b_b, w1, b1, w2, b2, w3, b3)


if __name__ == "__main__":
    key = jax.random.PRNGKey(0)
    k_x, k_p = jax.random.split(key)
    x = jax.random.normal(k_x, (B, T), jnp.float32)      # "inputs"
    adj = (jax.random.uniform(k_p, (B, B)) > 0.5).astype(jnp.float32)  # unused in forward
    params = init_params(k_p)

    out = gat_forward(x, params)
    jax.block_until_ready(out)

    ref = gat_reference(x, params)
    assert out.shape == (B, NCLASS)
    assert jnp.allclose(out, ref, atol=1e-4, rtol=1e-4), "mismatch vs JAX reference"
    print("KERNEL_OK")
</pallas_src>

<mosaic_0001>
module attributes {stable_mosaic.version = 11 : i64} {
  func.func @gat_kernel(%arg0: memref<16x8x1xf32, #tpu.memory_space<vmem>>, %arg1: memref<16x8x1xf32, #tpu.memory_space<vmem>>, %arg2: memref<1x256xf32, #tpu.memory_space<vmem>>, %arg3: memref<1x256xf32, #tpu.memory_space<vmem>>, %arg4: memref<1x256xf32, #tpu.memory_space<vmem>>, %arg5: memref<64x256xf32, #tpu.memory_space<vmem>>, %arg6: memref<64x32xf32, #tpu.memory_space<vmem>>, %arg7: memref<1x32xf32, #tpu.memory_space<vmem>>, %arg8: memref<32x16xf32, #tpu.memory_space<vmem>>, %arg9: memref<1x16xf32, #tpu.memory_space<vmem>>, %arg10: memref<16x4xf32, #tpu.memory_space<vmem>>, %arg11: memref<1x4xf32, #tpu.memory_space<vmem>>, %arg12: memref<8x4xf32, #tpu.memory_space<vmem>>, %arg13: memref<16x8x256xf32, #tpu.memory_space<vmem>>) attributes {dimension_semantics = [], scalar_prefetch = 0 : i64, scratch_operands = 1 : i64, tpu.core_type = #tpu.core_type<tc>} {
    %c0 = arith.constant 0 : index
    %c0_0 = arith.constant 0 : index
    %c0_1 = arith.constant 0 : index
    %0 = vector.load %arg0[%c0, %c0_0, %c0_1] : memref<16x8x1xf32, #tpu.memory_space<vmem>>, vector<16x8x1xf32>
    %c0_2 = arith.constant 0 : index
    %c0_3 = arith.constant 0 : index
    %1 = vector.load %arg2[%c0_2, %c0_3] : memref<1x256xf32, #tpu.memory_space<vmem>>, vector<1x256xf32>
    %2 = vector.shape_cast %1 : vector<1x256xf32> to vector<1x1x256xf32>
    %3 = vector.broadcast %0 : vector<16x8x1xf32> to vector<16x8x256xf32>
    %4 = vector.broadcast %2 : vector<1x1x256xf32> to vector<16x8x256xf32>
    %5 = arith.mulf %3, %4 : vector<16x8x256xf32>
    %c0_4 = arith.constant 0 : index
    %c0_5 = arith.constant 0 : index
    %c0_6 = arith.constant 0 : index
    %6 = vector.load %arg1[%c0_4, %c0_5, %c0_6] : memref<16x8x1xf32, #tpu.memory_space<vmem>>, vector<16x8x1xf32>
    %c0_7 = arith.constant 0 : index
    %c0_8 = arith.constant 0 : index
    %7 = vector.load %arg3[%c0_7, %c0_8] : memref<1x256xf32, #tpu.memory_space<vmem>>, vector<1x256xf32>
    %8 = vector.shape_cast %7 : vector<1x256xf32> to vector<1x1x256xf32>
    %9 = vector.broadcast %6 : vector<16x8x1xf32> to vector<16x8x256xf32>
    %10 = vector.broadcast %8 : vector<1x1x256xf32> to vector<16x8x256xf32>
    %11 = arith.mulf %9, %10 : vector<16x8x256xf32>
    %12 = arith.addf %5, %11 : vector<16x8x256xf32>
    %c0_9 = arith.constant 0 : index
    %c0_10 = arith.constant 0 : index
    %13 = vector.load %arg4[%c0_9, %c0_10] : memref<1x256xf32, #tpu.memory_space<vmem>>, vector<1x256xf32>
    %14 = vector.shape_cast %13 : vector<1x256xf32> to vector<1x1x256xf32>
    %15 = vector.broadcast %14 : vector<1x1x256xf32> to vector<16x8x256xf32>
    %16 = arith.addf %12, %15 : vector<16x8x256xf32>
    %c0_11 = arith.constant 0 : index
    %c0_12 = arith.constant 0 : index
    %c0_13 = arith.constant 0 : index
    %17 = vector.load %arg13[%c0_11, %c0_12, %c0_13] : memref<16x8x256xf32, #tpu.memory_space<vmem>>, vector<16x8x256xf32>
    tpu.vector_store %arg13[%c0_11, %c0_12, %c0_13], %16 {strides = array<i32>} : memref<16x8x256xf32, #tpu.memory_space<vmem>>, vector<16x8x256xf32>,
    %c0_14 = arith.constant 0 : index
    %c0_15 = arith.constant 0 : index
    %18 = vector.load %arg5[%c0_14, %c0_15] : memref<64x256xf32, #tpu.memory_space<vmem>>, vector<64x256xf32>
    %cst = arith.constant 0.000000e+00 : f32
    %19 = vector.broadcast %cst : f32 to vector<8x64xf32>
    %cst_16 = arith.constant 0.000000e+00 : f32
    %20 = vector.broadcast %cst_16 : f32 to vector<8x64xf32>
    %c0_17 = arith.constant 0 : index
    %c0_18 = arith.constant 0 : index
    %c0_19 = arith.constant 0 : index
    %21 = vector.load %arg13[%c0_17, %c0_18, %c0_19] : memref<16x8x256xf32, #tpu.memory_space<vmem>>, vector<1x8x256xf32>
    %22 = vector.shape_cast %21 : vector<1x8x256xf32> to vector<8x256xf32>
    %cst_20 = arith.constant dense<0.000000e+00> : vector<8x256xf32>
    %23 = tpu.matmul %19, %18, %cst_20 {dimension_numbers = #tpu.dot_dimension_numbers<[1], [0], [0], [1], [0, 0, 1, 1], [], []>} : vector<8x64xf32>, vector<64x256xf32>, vector<8x256xf32> -> vector<8x256xf32>
    %24 = arith.addf %22, %23 : vector<8x256xf32>
    %25 = arith.negf %24 : vector<8x256xf32>
    %26 = math.exp %25 : vector<8x256xf32>
    %cst_21 = arith.constant 1.000000e+00 : f32
    %27 = vector.broadcast %cst_21 : f32 to vector<8x256xf32>
    %28 = arith.addf %27, %26 : vector<8x256xf32>
    %29 = arith.divf %27, %28 : vector<8x256xf32>
    %30 = vector.extract_strided_slice %29 {offsets = [0, 0], sizes = [8, 64], strides = [1, 1]} : vector<8x256xf32> to vector<8x64xf32>
    %31 = vector.extract_strided_slice %29 {offsets = [0, 64], sizes = [8, 64], strides = [1, 1]} : vector<8x256xf32> to vector<8x64xf32>
    %32 = vector.extract_strided_slice %29 {offsets = [0, 192], sizes = [8, 64], strides = [1, 1]} : vector<8x256xf32> to vector<8x64xf32>
    %33 = vector.extract_strided_slice %24 {offsets = [0, 128], sizes = [8, 64], strides = [1, 1]} : vector<8x256xf32> to vector<8x64xf32>
    %34 = math.tanh %33 : vector<8x64xf32>
    %35 = arith.mulf %31, %20 : vector<8x64xf32>
    %36 = arith.mulf %30, %34 : vector<8x64xf32>
    %37 = arith.addf %35, %36 : vector<8x64xf32>
    %38 = math.tanh %37 : vector<8x64xf32>
    %39 = arith.mulf %32, %38 : vector<8x64xf32>
    %c1 = arith.constant 1 : index
    %c0_22 = arith.constant 0 : index
    %c0_23 = arith.constant 0 : index
    %40 = vector.load %arg13[%c1, %c0_22, %c0_23] : memref<16x8x256xf32, #tpu.memory_space<vmem>>, vector<1x8x256xf32>
    %41 = vector.shape_cast %40 : vector<1x8x256xf32> to vector<8x256xf32>
    %cst_24 = arith.constant dense<0.000000e+00> : vector<8x256xf32>
    %42 = tpu.matmul %39, %18, %cst_24 {dimension_numbers = #tpu.dot_dimension_numbers<[1], [0], [0], [1], [0, 0, 1, 1], [], []>} : vector<8x64xf32>, vector<64x256xf32>, vector<8x256xf32> -> vector<8x256xf32>
    %43 = arith.addf %41, %42 : vector<8x256xf32>
    %44 = arith.negf %43 : vector<8x256xf32>
    %45 = math.exp %44 : vector<8x256xf32>
    %cst_25 = arith.constant 1.000000e+00 : f32
    %46 = vector.broadcast %cst_25 : f32 to vector<8x256xf32>
    %47 = arith.addf %46, %45 : vector<8x256xf32>
    %48 = arith.divf %46, %47 : vector<8x256xf32>
    %49 = vector.extract_strided_slice %48 {offsets = [0, 0], sizes = [8, 64], strides = [1, 1]} : vector<8x256xf32> to vector<8x64xf32>
    %50 = vector.extract_strided_slice %48 {offsets = [0, 64], sizes = [8, 64], strides = [1, 1]} : vector<8x256xf32> to vector<8x64xf32>
    %51 = vector.extract_strided_slice %48 {offsets = [0, 192], sizes = [8, 64], strides = [1, 1]} : vector<8x256xf32> to vector<8x64xf32>
    %52 = vector.extract_strided_slice %43 {offsets = [0, 128], sizes = [8, 64], strides = [1, 1]} : vector<8x256xf32> to vector<8x64xf32>
    %53 = math.tanh %52 : vector<8x64xf32>
    %54 = arith.mulf %50, %37 : vector<8x64xf32>
    %55 = arith.mulf %49, %53 : vector<8x64xf32>
    %56 = arith.addf %54, %55 : vector<8x64xf32>
    %57 = math.tanh %56 : vector<8x64xf32>
    %58 = arith.mulf %51, %57 : vector<8x64xf32>
    %c2 = arith.constant 2 : index
    %c0_26 = arith.constant 0 : index
    %c0_27 = arith.constant 0 : index
    %59 = vector.load %arg13[%c2, %c0_26, %c0_27] : memref<16x8x256xf32, #tpu.memory_space<vmem>>, vector<1x8x256xf32>
    %60 = vector.shape_cast %59 : vector<1x8x256xf32> to vector<8x256xf32>
    %cst_28 = arith.constant dense<0.000000e+00> : vector<8x256xf32>
    %61 = tpu.matmul %58, %18, %cst_28 {dimension_numbers = #tpu.dot_dimension_numbers<[1], [0], [0], [1], [0, 0, 1, 1], [], []>} : vector<8x64xf32>, vector<64x256xf32>, vector<8x256xf32> -> vector<8x256xf32>
    %62 = arith.addf %60, %61 : vector<8x256xf32>
    %63 = arith.negf %62 : vector<8x256xf32>
    %64 = math.exp %63 : vector<8x256xf32>
    %cst_29 = arith.constant 1.000000e+00 : f32
    %65 = vector.broadcast %cst_29 : f32 to vector<8x256xf32>
    %66 = arith.addf %65, %64 : vector<8x256xf32>
    %67 = arith.divf %65, %66 : vector<8x256xf32>
    %68 = vector.extract_strided_slice %67 {offsets = [0, 0], sizes = [8, 64], strides = [1, 1]} : vector<8x256xf32> to vector<8x64xf32>
    %69 = vector.extract_strided_slice %67 {offsets = [0, 64], sizes = [8, 64], strides = [1, 1]} : vector<8x256xf32> to vector<8x64xf32>
    %70 = vector.extract_strided_slice %67 {offsets = [0, 192], sizes = [8, 64], strides = [1, 1]} : vector<8x256xf32> to vector<8x64xf32>
    %71 = vector.extract_strided_slice %62 {offsets = [0, 128], sizes = [8, 64], strides = [1, 1]} : vector<8x256xf32> to vector<8x64xf32>
    %72 = math.tanh %71 : vector<8x64xf32>
    %73 = arith.mulf %69, %56 : vector<8x64xf32>
    %74 = arith.mulf %68, %72 : vector<8x64xf32>
    %75 = arith.addf %73, %74 : vector<8x64xf32>
    %76 = math.tanh %75 : vector<8x64xf32>
    %77 = arith.mulf %70, %76 : vector<8x64xf32>
    %c3 = arith.constant 3 : index
    %c0_30 = arith.constant 0 : index
    %c0_31 = arith.constant 0 : index
    %78 = vector.load %arg13[%c3, %c0_30, %c0_31] : memref<16x8x256xf32, #tpu.memory_space<vmem>>, vector<1x8x256xf32>
    %79 = vector.shape_cast %78 : vector<1x8x256xf32> to vector<8x256xf32>
    %cst_32 = arith.constant dense<0.000000e+00> : vector<8x256xf32>
    %80 = tpu.matmul %77, %18, %cst_32 {dimension_numbers = #tpu.dot_dimension_numbers<[1], [0], [0], [1], [0, 0, 1, 1], [], []>} : vector<8x64xf32>, vector<64x256xf32>, vector<8x256xf32> -> vector<8x256xf32>
    %81 = arith.addf %79, %80 : vector<8x256xf32>
    %82 = arith.negf %81 : vector<8x256xf32>
    %83 = math.exp %82 : vector<8x256xf32>
    %cst_33 = arith.constant 1.000000e+00 : f32
    %84 = vector.broadcast %cst_33 : f32 to vector<8x256xf32>
    %85 = arith.addf %84, %83 : vector<8x256xf32>
    %86 = arith.divf %84, %85 : vector<8x256xf32>
    %87 = vector.extract_strided_slice %86 {offsets = [0, 0], sizes = [8, 64], strides = [1, 1]} : vector<8x256xf32> to vector<8x64xf32>
    %88 = vector.extract_strided_slice %86 {offsets = [0, 64], sizes = [8, 64], strides = [1, 1]} : vector<8x256xf32> to vector<8x64xf32>
    %89 = vector.extract_strided_slice %86 {offsets = [0, 192], sizes = [8, 64], strides = [1, 1]} : vector<8x256xf32> to vector<8x64xf32>
    %90 = vector.extract_strided_slice %81 {offsets = [0, 128], sizes = [8, 64], strides = [1, 1]} : vector<8x256xf32> to vector<8x64xf32>
    %91 = math.tanh %90 : vector<8x64xf32>
    %92 = arith.mulf %88, %75 : vector<8x64xf32>
    %93 = arith.mulf %87, %91 : vector<8x64xf32>
    %94 = arith.addf %92, %93 : vector<8x64xf32>
    %95 = math.tanh %94 : vector<8x64xf32>
    %96 = arith.mulf %89, %95 : vector<8x64xf32>
    %c4 = arith.constant 4 : index
    %c0_34 = arith.constant 0 : index
    %c0_35 = arith.constant 0 : index
    %97 = vector.load %arg13[%c4, %c0_34, %c0_35] : memref<16x8x256xf32, #tpu.memory_space<vmem>>, vector<1x8x256xf32>
    %98 = vector.shape_cast %97 : vector<1x8x256xf32> to vector<8x256xf32>
    %cst_36 = arith.constant dense<0.000000e+00> : vector<8x256xf32>
    %99 = tpu.matmul %96, %18, %cst_36 {dimension_numbers = #tpu.dot_dimension_numbers<[1], [0], [0], [1], [0, 0, 1, 1], [], []>} : vector<8x64xf32>, vector<64x256xf32>, vector<8x256xf32> -> vector<8x256xf32>
    %100 = arith.addf %98, %99 : vector<8x256xf32>
    %101 = arith.negf %100 : vector<8x256xf32>
    %102 = math.exp %101 : vector<8x256xf32>
    %cst_37 = arith.constant 1.000000e+00 : f32
    %103 = vector.broadcast %cst_37 : f32 to vector<8x256xf32>
    %104 = arith.addf %103, %102 : vector<8x256xf32>
    %105 = arith.divf %103, %104 : vector<8x256xf32>
    %106 = vector.extract_strided_slice %105 {offsets = [0, 0], sizes = [8, 64], strides = [1, 1]} : vector<8x256xf32> to vector<8x64xf32>
    %107 = vector.extract_strided_slice %105 {offsets = [0, 64], sizes = [8, 64], strides = [1, 1]} : vector<8x256xf32> to vector<8x64xf32>
    %108 = vector.extract_strided_slice %105 {offsets = [0, 192], sizes = [8, 64], strides = [1, 1]} : vector<8x256xf32> to vector<8x64xf32>
    %109 = vector.extract_strided_slice %100 {offsets = [0, 128], sizes = [8, 64], strides = [1, 1]} : vector<8x256xf32> to vector<8x64xf32>
    %110 = math.tanh %109 : vector<8x64xf32>
    %111 = arith.mulf %107, %94 : vector<8x64xf32>
    %112 = arith.mulf %106, %110 : vector<8x64xf32>
    %113 = arith.addf %111, %112 : vector<8x64xf32>
    %114 = math.tanh %113 : vector<8x64xf32>
    %115 = arith.mulf %108, %114 : vector<8x64xf32>
    %c5 = arith.constant 5 : index
    %c0_38 = arith.constant 0 : index
    %c0_39 = arith.constant 0 : index
    %116 = vector.load %arg13[%c5, %c0_38, %c0_39] : memref<16x8x256xf32, #tpu.memory_space<vmem>>, vector<1x8x256xf32>
    %117 = vector.shape_cast %116 : vector<1x8x256xf32> to vector<8x256xf32>
    %cst_40 = arith.constant dense<0.000000e+00> : vector<8x256xf32>
    %118 = tpu.matmul %115, %18, %cst_40 {dimension_numbers = #tpu.dot_dimension_numbers<[1], [0], [0], [1], [0, 0, 1, 1], [], []>} : vector<8x64xf32>, vector<64x256xf32>, vector<8x256xf32> -> vector<8x256xf32>
    %119 = arith.addf %117, %118 : vector<8x256xf32>
    %120 = arith.negf %119 : vector<8x256xf32>
    %121 = math.exp %120 : vector<8x256xf32>
    %cst_41 = arith.constant 1.000000e+00 : f32
    %122 = vector.broadcast %cst_41 : f32 to vector<8x256xf32>
    %123 = arith.addf %122, %121 : vector<8x256xf32>
    %124 = arith.divf %122, %123 : vector<8x256xf32>
    %125 = vector.extract_strided_slice %124 {offsets = [0, 0], sizes = [8, 64], strides = [1, 1]} : vector<8x256xf32> to vector<8x64xf32>
    %126 = vector.extract_strided_slice %124 {offsets = [0, 64], sizes = [8, 64], strides = [1, 1]} : vector<8x256xf32> to vector<8x64xf32>
    %127 = vector.extract_strided_slice %124 {offsets = [0, 192], sizes = [8, 64], strides = [1, 1]} : vector<8x256xf32> to vector<8x64xf32>
    %128 = vector.extract_strided_slice %119 {offsets = [0, 128], sizes = [8, 64], strides = [1, 1]} : vector<8x256xf32> to vector<8x64xf32>
    %129 = math.tanh %128 : vector<8x64xf32>
    %130 = arith.mulf %126, %113 : vector<8x64xf32>
    %131 = arith.mulf %125, %129 : vector<8x64xf32>
    %132 = arith.addf %130, %131 : vector<8x64xf32>
    %133 = math.tanh %132 : vector<8x64xf32>
    %134 = arith.mulf %127, %133 : vector<8x64xf32>
    %c6 = arith.constant 6 : index
    %c0_42 = arith.constant 0 : index
    %c0_43 = arith.constant 0 : index
    %135 = vector.load %arg13[%c6, %c0_42, %c0_43] : memref<16x8x256xf32, #tpu.memory_space<vmem>>, vector<1x8x256xf32>
    %136 = vector.shape_cast %135 : vector<1x8x256xf32> to vector<8x256xf32>
    %cst_44 = arith.constant dense<0.000000e+00> : vector<8x256xf32>
    %137 = tpu.matmul %134, %18, %cst_44 {dimension_numbers = #tpu.dot_dimension_numbers<[1], [0], [0], [1], [0, 0, 1, 1], [], []>} : vector<8x64xf32>, vector<64x256xf32>, vector<8x256xf32> -> vector<8x256xf32>
    %138 = arith.addf %136, %137 : vector<8x256xf32>
    %139 = arith.negf %138 : vector<8x256xf32>
    %140 = math.exp %139 : vector<8x256xf32>
    %cst_45 = arith.constant 1.000000e+00 : f32
    %141 = vector.broadcast %cst_45 : f32 to vector<8x256xf32>
    %142 = arith.addf %141, %140 : vector<8x256xf32>
    %143 = arith.divf %141, %142 : vector<8x256xf32>
    %144 = vector.extract_strided_slice %143 {offsets = [0, 0], sizes = [8, 64], strides = [1, 1]} : vector<8x256xf32> to vector<8x64xf32>
    %145 = vector.extract_strided_slice %143 {offsets = [0, 64], sizes = [8, 64], strides = [1, 1]} : vector<8x256xf32> to vector<8x64xf32>
    %146 = vector.extract_strided_slice %143 {offsets = [0, 192], sizes = [8, 64], strides = [1, 1]} : vector<8x256xf32> to vector<8x64xf32>
    %147 = vector.extract_strided_slice %138 {offsets = [0, 128], sizes = [8, 64], strides = [1, 1]} : vector<8x256xf32> to vector<8x64xf32>
    %148 = math.tanh %147 : vector<8x64xf32>
    %149 = arith.mulf %145, %132 : vector<8x64xf32>
    %150 = arith.mulf %144, %148 : vector<8x64xf32>
    %151 = arith.addf %149, %150 : vector<8x64xf32>
    %152 = math.tanh %151 : vector<8x64xf32>
    %153 = arith.mulf %146, %152 : vector<8x64xf32>
    %c7 = arith.constant 7 : index
    %c0_46 = arith.constant 0 : index
    %c0_47 = arith.constant 0 : index
    %154 = vector.load %arg13[%c7, %c0_46, %c0_47] : memref<16x8x256xf32, #tpu.memory_space<vmem>>, vector<1x8x256xf32>
    %155 = vector.shape_cast %154 : vector<1x8x256xf32> to vector<8x256xf32>
    %cst_48 = arith.constant dense<0.000000e+00> : vector<8x256xf32>
    %156 = tpu.matmul %153, %18, %cst_48 {dimension_numbers = #tpu.dot_dimension_numbers<[1], [0], [0], [1], [0, 0, 1, 1], [], []>} : vector<8x64xf32>, vector<64x256xf32>, vector<8x256xf32> -> vector<8x256xf32>
    %157 = arith.addf %155, %156 : vector<8x256xf32>
    %158 = arith.negf %157 : vector<8x256xf32>
    %159 = math.exp %158 : vector<8x256xf32>
    %cst_49 = arith.constant 1.000000e+00 : f32
    %160 = vector.broadcast %cst_49 : f32 to vector<8x256xf32>
    %161 = arith.addf %160, %159 : vector<8x256xf32>
    %162 = arith.divf %160, %161 : vector<8x256xf32>
    %163 = vector.extract_strided_slice %162 {offsets = [0, 0], sizes = [8, 64], strides = [1, 1]} : vector<8x256xf32> to vector<8x64xf32>
    %164 = vector.extract_strided_slice %162 {offsets = [0, 64], sizes = [8, 64], strides = [1, 1]} : vector<8x256xf32> to vector<8x64xf32>
    %165 = vector.extract_strided_slice %162 {offsets = [0, 192], sizes = [8, 64], strides = [1, 1]} : vector<8x256xf32> to vector<8x64xf32>
    %166 = vector.extract_strided_slice %157 {offsets = [0, 128], sizes = [8, 64], strides = [1, 1]} : vector<8x256xf32> to vector<8x64xf32>
    %167 = math.tanh %166 : vector<8x64xf32>
    %168 = arith.mulf %164, %151 : vector<8x64xf32>
    %169 = arith.mulf %163, %167 : vector<8x64xf32>
    %170 = arith.addf %168, %169 : vector<8x64xf32>
    %171 = math.tanh %170 : vector<8x64xf32>
    %172 = arith.mulf %165, %171 : vector<8x64xf32>
    %c8 = arith.constant 8 : index
    %c0_50 = arith.constant 0 : index
    %c0_51 = arith.constant 0 : index
    %173 = vector.load %arg13[%c8, %c0_50, %c0_51] : memref<16x8x256xf32, #tpu.memory_space<vmem>>, vector<1x8x256xf32>
    %174 = vector.shape_cast %173 : vector<1x8x256xf32> to vector<8x256xf32>
    %cst_52 = arith.constant dense<0.000000e+00> : vector<8x256xf32>
    %175 = tpu.matmul %172, %18, %cst_52 {dimension_numbers = #tpu.dot_dimension_numbers<[1], [0], [0], [1], [0, 0, 1, 1], [], []>} : vector<8x64xf32>, vector<64x256xf32>, vector<8x256xf32> -> vector<8x256xf32>
    %176 = arith.addf %174, %175 : vector<8x256xf32>
    %177 = arith.negf %176 : vector<8x256xf32>
    %178 = math.exp %177 : vector<8x256xf32>
    %cst_53 = arith.constant 1.000000e+00 : f32
    %179 = vector.broadcast %cst_53 : f32 to vector<8x256xf32>
    %180 = arith.addf %179, %178 : vector<8x256xf32>
    %181 = arith.divf %179, %180 : vector<8x256xf32>
    %182 = vector.extract_strided_slice %181 {offsets = [0, 0], sizes = [8, 64], strides = [1, 1]} : vector<8x256xf32> to vector<8x64xf32>
    %183 = vector.extract_strided_slice %181 {offsets = [0, 64], sizes = [8, 64], strides = [1, 1]} : vector<8x256xf32> to vector<8x64xf32>
    %184 = vector.extract_strided_slice %181 {offsets = [0, 192], sizes = [8, 64], strides = [1, 1]} : vector<8x256xf32> to vector<8x64xf32>
    %185 = vector.extract_strided_slice %176 {offsets = [0, 128], sizes = [8, 64], strides = [1, 1]} : vector<8x256xf32> to vector<8x64xf32>
    %186 = math.tanh %185 : vector<8x64xf32>
    %187 = arith.mulf %183, %170 : vector<8x64xf32>
    %188 = arith.mulf %182, %186 : vector<8x64xf32>
    %189 = arith.addf %187, %188 : vector<8x64xf32>
    %190 = math.tanh %189 : vector<8x64xf32>
    %191 = arith.mulf %184, %190 : vector<8x64xf32>
    %c9 = arith.constant 9 : index
    %c0_54 = arith.constant 0 : index
    %c0_55 = arith.constant 0 : index
    %192 = vector.load %arg13[%c9, %c0_54, %c0_55] : memref<16x8x256xf32, #tpu.memory_space<vmem>>, vector<1x8x256xf32>
    %193 = vector.shape_cast %192 : vector<1x8x256xf32> to vector<8x256xf32>
    %cst_56 = arith.constant dense<0.000000e+00> : vector<8x256xf32>
    %194 = tpu.matmul %191, %18, %cst_56 {dimension_numbers = #tpu.dot_dimension_numbers<[1], [0], [0], [1], [0, 0, 1, 1], [], []>} : vector<8x64xf32>, vector<64x256xf32>, vector<8x256xf32> -> vector<8x256xf32>
    %195 = arith.addf %193, %194 : vector<8x256xf32>
    %196 = arith.negf %195 : vector<8x256xf32>
    %197 = math.exp %196 : vector<8x256xf32>
    %cst_57 = arith.constant 1.000000e+00 : f32
    %198 = vector.broadcast %cst_57 : f32 to vector<8x256xf32>
    %199 = arith.addf %198, %197 : vector<8x256xf32>
    %200 = arith.divf %198, %199 : vector<8x256xf32>
    %201 = vector.extract_strided_slice %200 {offsets = [0, 0], sizes = [8, 64], strides = [1, 1]} : vector<8x256xf32> to vector<8x64xf32>
    %202 = vector.extract_strided_slice %200 {offsets = [0, 64], sizes = [8, 64], strides = [1, 1]} : vector<8x256xf32> to vector<8x64xf32>
    %203 = vector.extract_strided_slice %200 {offsets = [0, 192], sizes = [8, 64], strides = [1, 1]} : vector<8x256xf32> to vector<8x64xf32>
    %204 = vector.extract_strided_slice %195 {offsets = [0, 128], sizes = [8, 64], strides = [1, 1]} : vector<8x256xf32> to vector<8x64xf32>
    %205 = math.tanh %204 : vector<8x64xf32>
    %206 = arith.mulf %202, %189 : vector<8x64xf32>
    %207 = arith.mulf %201, %205 : vector<8x64xf32>
    %208 = arith.addf %206, %207 : vector<8x64xf32>
    %209 = math.tanh %208 : vector<8x64xf32>
    %210 = arith.mulf %203, %209 : vector<8x64xf32>
    %c10 = arith.constant 10 : index
    %c0_58 = arith.constant 0 : index
    %c0_59 = arith.constant 0 : index
    %211 = vector.load %arg13[%c10, %c0_58, %c0_59] : memref<16x8x256xf32, #tpu.memory_space<vmem>>, vector<1x8x256xf32>
    %212 = vector.shape_cast %211 : vector<1x8x256xf32> to vector<8x256xf32>
    %cst_60 = arith.constant dense<0.000000e+00> : vector<8x256xf32>
    %213 = tpu.matmul %210, %18, %cst_60 {dimension_numbers = #tpu.dot_dimension_numbers<[1], [0], [0], [1], [0, 0, 1, 1], [], []>} : vector<8x64xf32>, vector<64x256xf32>, vector<8x256xf32> -> vector<8x256xf32>
    %214 = arith.addf %212, %213 : vector<8x256xf32>
    %215 = arith.negf %214 : vector<8x256xf32>
    %216 = math.exp %215 : vector<8x256xf32>
    %cst_61 = arith.constant 1.000000e+00 : f32
    %217 = vector.broadcast %cst_61 : f32 to vector<8x256xf32>
    %218 = arith.addf %217, %216 : vector<8x256xf32>
    %219 = arith.divf %217, %218 : vector<8x256xf32>
    %220 = vector.extract_strided_slice %219 {offsets = [0, 0], sizes = [8, 64], strides = [1, 1]} : vector<8x256xf32> to vector<8x64xf32>
    %221 = vector.extract_strided_slice %219 {offsets = [0, 64], sizes = [8, 64], strides = [1, 1]} : vector<8x256xf32> to vector<8x64xf32>
    %222 = vector.extract_strided_slice %219 {offsets = [0, 192], sizes = [8, 64], strides = [1, 1]} : vector<8x256xf32> to vector<8x64xf32>
    %223 = vector.extract_strided_slice %214 {offsets = [0, 128], sizes = [8, 64], strides = [1, 1]} : vector<8x256xf32> to vector<8x64xf32>
    %224 = math.tanh %223 : vector<8x64xf32>
    %225 = arith.mulf %221, %208 : vector<8x64xf32>
    %226 = arith.mulf %220, %224 : vector<8x64xf32>
    %227 = arith.addf %225, %226 : vector<8x64xf32>
    %228 = math.tanh %227 : vector<8x64xf32>
    %229 = arith.mulf %222, %228 : vector<8x64xf32>
    %c11 = arith.constant 11 : index
    %c0_62 = arith.constant 0 : index
    %c0_63 = arith.constant 0 : index
    %230 = vector.load %arg13[%c11, %c0_62, %c0_63] : memref<16x8x256xf32, #tpu.memory_space<vmem>>, vector<1x8x256xf32>
    %231 = vector.shape_cast %230 : vector<1x8x256xf32> to vector<8x256xf32>
    %cst_64 = arith.constant dense<0.000000e+00> : vector<8x256xf32>
    %232 = tpu.matmul %229, %18, %cst_64 {dimension_numbers = #tpu.dot_dimension_numbers<[1], [0], [0], [1], [0, 0, 1, 1], [], []>} : vector<8x64xf32>, vector<64x256xf32>, vector<8x256xf32> -> vector<8x256xf32>
    %233 = arith.addf %231, %232 : vector<8x256xf32>
    %234 = arith.negf %233 : vector<8x256xf32>
    %235 = math.exp %234 : vector<8x256xf32>
    %cst_65 = arith.constant 1.000000e+00 : f32
    %236 = vector.broadcast %cst_65 : f32 to vector<8x256xf32>
    %237 = arith.addf %236, %235 : vector<8x256xf32>
    %238 = arith.divf %236, %237 : vector<8x256xf32>
    %239 = vector.extract_strided_slice %238 {offsets = [0, 0], sizes = [8, 64], strides = [1, 1]} : vector<8x256xf32> to vector<8x64xf32>
    %240 = vector.extract_strided_slice %238 {offsets = [0, 64], sizes = [8, 64], strides = [1, 1]} : vector<8x256xf32> to vector<8x64xf32>
    %241 = vector.extract_strided_slice %238 {offsets = [0, 192], sizes = [8, 64], strides = [1, 1]} : vector<8x256xf32> to vector<8x64xf32>
    %242 = vector.extract_strided_slice %233 {offsets = [0, 128], sizes = [8, 64], strides = [1, 1]} : vector<8x256xf32> to vector<8x64xf32>
    %243 = math.tanh %242 : vector<8x64xf32>
    %244 = arith.mulf %240, %227 : vector<8x64xf32>
    %245 = arith.mulf %239, %243 : vector<8x64xf32>
    %246 = arith.addf %244, %245 : vector<8x64xf32>
    %247 = math.tanh %246 : vector<8x64xf32>
    %248 = arith.mulf %241, %247 : vector<8x64xf32>
    %c12 = arith.constant 12 : index
    %c0_66 = arith.constant 0 : index
    %c0_67 = arith.constant 0 : index
    %249 = vector.load %arg13[%c12, %c0_66, %c0_67] : memref<16x8x256xf32, #tpu.memory_space<vmem>>, vector<1x8x256xf32>
    %250 = vector.shape_cast %249 : vector<1x8x256xf32> to vector<8x256xf32>
    %cst_68 = arith.constant dense<0.000000e+00> : vector<8x256xf32>
    %251 = tpu.matmul %248, %18, %cst_68 {dimension_numbers = #tpu.dot_dimension_numbers<[1], [0], [0], [1], [0, 0, 1, 1], [], []>} : vector<8x64xf32>, vector<64x256xf32>, vector<8x256xf32> -> vector<8x256xf32>
    %252 = arith.addf %250, %251 : vector<8x256xf32>
    %253 = arith.negf %252 : vector<8x256xf32>
    %254 = math.exp %253 : vector<8x256xf32>
    %cst_69 = arith.constant 1.000000e+00 : f32
    %255 = vector.broadcast %cst_69 : f32 to vector<8x256xf32>
    %256 = arith.addf %255, %254 : vector<8x256xf32>
    %257 = arith.divf %255, %256 : vector<8x256xf32>
    %258 = vector.extract_strided_slice %257 {offsets = [0, 0], sizes = [8, 64], strides = [1, 1]} : vector<8x256xf32> to vector<8x64xf32>
    %259 = vector.extract_strided_slice %257 {offsets = [0, 64], sizes = [8, 64], strides = [1, 1]} : vector<8x256xf32> to vector<8x64xf32>
    %260 = vector.extract_strided_slice %257 {offsets = [0, 192], sizes = [8, 64], strides = [1, 1]} : vector<8x256xf32> to vector<8x64xf32>
    %261 = vector.extract_strided_slice %252 {offsets = [0, 128], sizes = [8, 64], strides = [1, 1]} : vector<8x256xf32> to vector<8x64xf32>
    %262 = math.tanh %261 : vector<8x64xf32>
    %263 = arith.mulf %259, %246 : vector<8x64xf32>
    %264 = arith.mulf %258, %262 : vector<8x64xf32>
    %265 = arith.addf %263, %264 : vector<8x64xf32>
    %266 = math.tanh %265 : vector<8x64xf32>
    %267 = arith.mulf %260, %266 : vector<8x64xf32>
    %c13 = arith.constant 13 : index
    %c0_70 = arith.constant 0 : index
    %c0_71 = arith.constant 0 : index
    %268 = vector.load %arg13[%c13, %c0_70, %c0_71] : memref<16x8x256xf32, #tpu.memory_space<vmem>>, vector<1x8x256xf32>
    %269 = vector.shape_cast %268 : vector<1x8x256xf32> to vector<8x256xf32>
    %cst_72 = arith.constant dense<0.000000e+00> : vector<8x256xf32>
    %270 = tpu.matmul %267, %18, %cst_72 {dimension_numbers = #tpu.dot_dimension_numbers<[1], [0], [0], [1], [0, 0, 1, 1], [], []>} : vector<8x64xf32>, vector<64x256xf32>, vector<8x256xf32> -> vector<8x256xf32>
    %271 = arith.addf %269, %270 : vector<8x256xf32>
    %272 = arith.negf %271 : vector<8x256xf32>
    %273 = math.exp %272 : vector<8x256xf32>
    %cst_73 = arith.constant 1.000000e+00 : f32
    %274 = vector.broadcast %cst_73 : f32 to vector<8x256xf32>
    %275 = arith.addf %274, %273 : vector<8x256xf32>
    %276 = arith.divf %274, %275 : vector<8x256xf32>
    %277 = vector.extract_strided_slice %276 {offsets = [0, 0], sizes = [8, 64], strides = [1, 1]} : vector<8x256xf32> to vector<8x64xf32>
    %278 = vector.extract_strided_slice %276 {offsets = [0, 64], sizes = [8, 64], strides = [1, 1]} : vector<8x256xf32> to vector<8x64xf32>
    %279 = vector.extract_strided_slice %276 {offsets = [0, 192], sizes = [8, 64], strides = [1, 1]} : vector<8x256xf32> to vector<8x64xf32>
    %280 = vector.extract_strided_slice %271 {offsets = [0, 128], sizes = [8, 64], strides = [1, 1]} : vector<8x256xf32> to vector<8x64xf32>
    %281 = math.tanh %280 : vector<8x64xf32>
    %282 = arith.mulf %278, %265 : vector<8x64xf32>
    %283 = arith.mulf %277, %281 : vector<8x64xf32>
    %284 = arith.addf %282, %283 : vector<8x64xf32>
    %285 = math.tanh %284 : vector<8x64xf32>
    %286 = arith.mulf %279, %285 : vector<8x64xf32>
    %c14 = arith.constant 14 : index
    %c0_74 = arith.constant 0 : index
    %c0_75 = arith.constant 0 : index
    %287 = vector.load %arg13[%c14, %c0_74, %c0_75] : memref<16x8x256xf32, #tpu.memory_space<vmem>>, vector<1x8x256xf32>
    %288 = vector.shape_cast %287 : vector<1x8x256xf32> to vector<8x256xf32>
    %cst_76 = arith.constant dense<0.000000e+00> : vector<8x256xf32>
    %289 = tpu.matmul %286, %18, %cst_76 {dimension_numbers = #tpu.dot_dimension_numbers<[1], [0], [0], [1], [0, 0, 1, 1], [], []>} : vector<8x64xf32>, vector<64x256xf32>, vector<8x256xf32> -> vector<8x256xf32>
    %290 = arith.addf %288, %289 : vector<8x256xf32>
    %291 = arith.negf %290 : vector<8x256xf32>
    %292 = math.exp %291 : vector<8x256xf32>
    %cst_77 = arith.constant 1.000000e+00 : f32
    %293 = vector.broadcast %cst_77 : f32 to vector<8x256xf32>
    %294 = arith.addf %293, %292 : vector<8x256xf32>
    %295 = arith.divf %293, %294 : vector<8x256xf32>
    %296 = vector.extract_strided_slice %295 {offsets = [0, 0], sizes = [8, 64], strides = [1, 1]} : vector<8x256xf32> to vector<8x64xf32>
    %297 = vector.extract_strided_slice %295 {offsets = [0, 64], sizes = [8, 64], strides = [1, 1]} : vector<8x256xf32> to vector<8x64xf32>
    %298 = vector.extract_strided_slice %295 {offsets = [0, 192], sizes = [8, 64], strides = [1, 1]} : vector<8x256xf32> to vector<8x64xf32>
    %299 = vector.extract_strided_slice %290 {offsets = [0, 128], sizes = [8, 64], strides = [1, 1]} : vector<8x256xf32> to vector<8x64xf32>
    %300 = math.tanh %299 : vector<8x64xf32>
    %301 = arith.mulf %297, %284 : vector<8x64xf32>
    %302 = arith.mulf %296, %300 : vector<8x64xf32>
    %303 = arith.addf %301, %302 : vector<8x64xf32>
    %304 = math.tanh %303 : vector<8x64xf32>
    %305 = arith.mulf %298, %304 : vector<8x64xf32>
    %c15 = arith.constant 15 : index
    %c0_78 = arith.constant 0 : index
    %c0_79 = arith.constant 0 : index
    %306 = vector.load %arg13[%c15, %c0_78, %c0_79] : memref<16x8x256xf32, #tpu.memory_space<vmem>>, vector<1x8x256xf32>
    %307 = vector.shape_cast %306 : vector<1x8x256xf32> to vector<8x256xf32>
    %cst_80 = arith.constant dense<0.000000e+00> : vector<8x256xf32>
    %308 = tpu.matmul %305, %18, %cst_80 {dimension_numbers = #tpu.dot_dimension_numbers<[1], [0], [0], [1], [0, 0, 1, 1], [], []>} : vector<8x64xf32>, vector<64x256xf32>, vector<8x256xf32> -> vector<8x256xf32>
    %309 = arith.addf %307, %308 : vector<8x256xf32>
    %310 = arith.negf %309 : vector<8x256xf32>
    %311 = math.exp %310 : vector<8x256xf32>
    %cst_81 = arith.constant 1.000000e+00 : f32
    %312 = vector.broadcast %cst_81 : f32 to vector<8x256xf32>
    %313 = arith.addf %312, %311 : vector<8x256xf32>
    %314 = arith.divf %312, %313 : vector<8x256xf32>
    %315 = vector.extract_strided_slice %314 {offsets = [0, 0], sizes = [8, 64], strides = [1, 1]} : vector<8x256xf32> to vector<8x64xf32>
    %316 = vector.extract_strided_slice %314 {offsets = [0, 64], sizes = [8, 64], strides = [1, 1]} : vector<8x256xf32> to vector<8x64xf32>
    %317 = vector.extract_strided_slice %314 {offsets = [0, 192], sizes = [8, 64], strides = [1, 1]} : vector<8x256xf32> to vector<8x64xf32>
    %318 = vector.extract_strided_slice %309 {offsets = [0, 128], sizes = [8, 64], strides = [1, 1]} : vector<8x256xf32> to vector<8x64xf32>
    %319 = math.tanh %318 : vector<8x64xf32>
    %320 = arith.mulf %316, %303 : vector<8x64xf32>
    %321 = arith.mulf %315, %319 : vector<8x64xf32>
    %322 = arith.addf %320, %321 : vector<8x64xf32>
    %323 = math.tanh %322 : vector<8x64xf32>
    %324 = arith.mulf %317, %323 : vector<8x64xf32>
    %c0_82 = arith.constant 0 : index
    %c0_83 = arith.constant 0 : index
    %325 = vector.load %arg6[%c0_82, %c0_83] : memref<64x32xf32, #tpu.memory_space<vmem>>, vector<64x32xf32>
    %cst_84 = arith.constant dense<0.000000e+00> : vector<8x32xf32>
    %326 = tpu.matmul %324, %325, %cst_84 {dimension_numbers = #tpu.dot_dimension_numbers<[1], [0], [0], [1], [0, 0, 1, 1], [], []>} : vector<8x64xf32>, vector<64x32xf32>, vector<8x32xf32> -> vector<8x32xf32>
    %c0_85 = arith.constant 0 : index
    %c0_86 = arith.constant 0 : index
    %327 = vector.load %arg7[%c0_85, %c0_86] : memref<1x32xf32, #tpu.memory_space<vmem>>, vector<1x32xf32>
    %328 = vector.broadcast %327 : vector<1x32xf32> to vector<8x32xf32>
    %329 = arith.addf %326, %328 : vector<8x32xf32>
    %cst_87 = arith.constant 0.000000e+00 : f32
    %330 = vector.broadcast %cst_87 : f32 to vector<8x32xf32>
    %331 = arith.maximumf %329, %330 : vector<8x32xf32>
    %c0_88 = arith.constant 0 : index
    %c0_89 = arith.constant 0 : index
    %332 = vector.load %arg8[%c0_88, %c0_89] : memref<32x16xf32, #tpu.memory_space<vmem>>, vector<32x16xf32>
    %cst_90 = arith.constant dense<0.000000e+00> : vector<8x16xf32>
    %333 = tpu.matmul %331, %332, %cst_90 {dimension_numbers = #tpu.dot_dimension_numbers<[1], [0], [0], [1], [0, 0, 1, 1], [], []>} : vector<8x32xf32>, vector<32x16xf32>, vector<8x16xf32> -> vector<8x16xf32>
    %c0_91 = arith.constant 0 : index
    %c0_92 = arith.constant 0 : index
    %334 = vector.load %arg9[%c0_91, %c0_92] : memref<1x16xf32, #tpu.memory_space<vmem>>, vector<1x16xf32>
    %335 = vector.broadcast %334 : vector<1x16xf32> to vector<8x16xf32>
    %336 = arith.addf %333, %335 : vector<8x16xf32>
    %cst_93 = arith.constant 0.000000e+00 : f32
    %337 = vector.broadcast %cst_93 : f32 to vector<8x16xf32>
    %338 = arith.maximumf %336, %337 : vector<8x16xf32>
    %c0_94 = arith.constant 0 : index
    %c0_95 = arith.constant 0 : index
    %339 = vector.load %arg10[%c0_94, %c0_95] : memref<16x4xf32, #tpu.memory_space<vmem>>, vector<16x4xf32>
    %cst_96 = arith.constant dense<0.000000e+00> : vector<8x4xf32>
    %340 = tpu.matmul %338, %339, %cst_96 {dimension_numbers = #tpu.dot_dimension_numbers<[1], [0], [0], [1], [0, 0, 1, 1], [], []>} : vector<8x16xf32>, vector<16x4xf32>, vector<8x4xf32> -> vector<8x4xf32>
    %c0_97 = arith.constant 0 : index
    %c0_98 = arith.constant 0 : index
    %341 = vector.load %arg11[%c0_97, %c0_98] : memref<1x4xf32, #tpu.memory_space<vmem>>, vector<1x4xf32>
    %342 = vector.broadcast %341 : vector<1x4xf32> to vector<8x4xf32>
    %343 = arith.addf %340, %342 : vector<8x4xf32>
    %cst_99 = arith.constant dense<0xFF800000> : vector<8xf32>
    %344 = vector.multi_reduction <maximumf>, %343, %cst_99 [1] : vector<8x4xf32> to vector<8xf32>
    %345 = vector.shape_cast %344 : vector<8xf32> to vector<8x1xf32>
    %346 = vector.broadcast %345 : vector<8x1xf32> to vector<8x4xf32>
    %347 = arith.subf %343, %346 : vector<8x4xf32>
    %348 = math.exp %347 : vector<8x4xf32>
    %cst_100 = arith.constant dense<0.000000e+00> : vector<8xf32>
    %349 = vector.multi_reduction <add>, %348, %cst_100 [1] : vector<8x4xf32> to vector<8xf32>
    %350 = vector.shape_cast %349 : vector<8xf32> to vector<8x1xf32>
    %351 = math.log %350 : vector<8x1xf32>
    %352 = vector.broadcast %351 : vector<8x1xf32> to vector<8x4xf32>
    %353 = arith.subf %347, %352 : vector<8x4xf32>
    %c0_101 = arith.constant 0 : index
    %c0_102 = arith.constant 0 : index
    %354 = vector.load %arg12[%c0_101, %c0_102] : memref<8x4xf32, #tpu.memory_space<vmem>>, vector<8x4xf32>
    tpu.vector_store %arg12[%c0_101, %c0_102], %353 {strides = array<i32>} : memref<8x4xf32, #tpu.memory_space<vmem>>, vector<8x4xf32>,
    return
  }
}

</mosaic_0001>

<bundles_post_ra>
// kernel: tpu_custom_call.1
= control target key start
LH: loop header
LB: loop body
LE: loop exit
PB: predicated region body
PF: predicated region fallthrough
CT: control target
= control target key end

     0   :  { %v2956_v3 = vmov 0.0   ;;  %v2957_v4 = vmov 0   ;;  %v139_v29 = vlaneseq  ;;  %vm447_vm0 = vcmask 523264   ;;  %s3563_s5 = inlined_call_operand.vmem [shape: f32[64,256], index: 5, kind: input, shape index: {}]   ;;  %s3564_s0 = inlined_call_operand.vmem [shape: f32[16,8,1], index: 0, kind: input, shape index: {}]   ;;  %s3565_s1 = inlined_call_operand.vmem [shape: f32[16,8,1], index: 1, kind: input, shape index: {}]   ;;  %s3566_s2 = inlined_call_operand.vmem [shape: f32[1,256], index: 2, kind: input, shape index: {}]   ;;  %s3567_s3 = inlined_call_operand.vmem [shape: f32[1,256], index: 3, kind: input, shape index: {}]   ;;  %s3568_s4 = inlined_call_operand.vmem [shape: f32[1,256], index: 4, kind: input, shape index: {}]   ;;  %s3569_s6 = inlined_call_operand.vmem [shape: f32[64,32], index: 6, kind: input, shape index: {}]   ;;  %s3570_s8 = inlined_call_operand.vmem [shape: f32[32,16], index: 8, kind: input, shape index: {}]   ;;  %s3571_s7 = inlined_call_operand.vmem [shape: f32[1,32], index: 7, kind: input, shape index: {}]   ;;  %s3572_s10 = inlined_call_operand.vmem [shape: f32[16,4], index: 10, kind: input, shape index: {}]   ;;  %s3573_s9 = inlined_call_operand.vmem [shape: f32[1,16], index: 9, kind: input, shape index: {}]   ;;  %s3574_s11 = inlined_call_operand.vmem [shape: f32[1,4], index: 11, kind: input, shape index: {}]   ;;  %s3575_s12 = inlined_call_operand.vmem [shape: f32[8,4], index: 12, kind: output, shape index: {}]  }
   0x1   :  { %v430_v0 = vld [vmem:[%s3563_s5 + $0x8] sm:$0xff]  ;;  %v432_v1 = vld [vmem:[%s3563_s5 + $0x18] sm:$0xff]  ;;  %v429_v2 = vld [vmem:[%s3563_s5] sm:$0xff]  ;;  %515 = vmatprep.mubr.f32.mxu0 %v2956_v3  ;;  %2758 = vset.pattern.permute.xlu0 %v2957_v4  ;;  %vm2960_vm1 = vmmov 0   ;;  %vm2193_vm2 = vcmask 261120   ;;  %vm2277_vm3 = vcmask 130048  }
   0x2   :  { %v3036_v5 = vpack.c.bf16 %v432_v1, %v430_v0  ;;  %v431_v6 = vld [vmem:[%s3563_s5 + $0x10] sm:$0xff]  ;;  %v434_v7 = vld [vmem:[%s3563_s5 + $0x28] sm:$0xff]  ;;  %v436_v8 = vld [vmem:[%s3563_s5 + $0x38] sm:$0xff]  ;;  %2759 = vset.pattern.permute.xlu1 %v2957_v4  ;;  %618 = vmatprep.mubr.f32.mxu1 %v2956_v3  ;;  %v140_v30 = vshrl.u32 %v139_v29, 7  ;;  %vm2351_vm4 = vcmask 31744  }
   0x3   :  { %v3048_v9 = vpack.c.bf16 %v431_v6, %v429_v2  ;;  %v3050_v10 = vpack.c.bf16 %v436_v8, %v434_v7  ;;  %v433_v11 = vld [vmem:[%s3563_s5 + $0x20] sm:$0xff]  ;;  %v435_v12 = vld [vmem:[%s3563_s5 + $0x30] sm:$0xff]  ;;  %v438_v13 = vld [vmem:[%s3563_s5 + $0x48] sm:$0xff] }
   0x4   :  { %2477 = vmatprep.subr.bf16.mxu0 %v3036_v5  ;;  %v440_v14 = vld [vmem:[%s3563_s5 + $0x58] sm:$0xff]  ;;  %2493 = vmatprep.subr.bf16.mxu1 %v3036_v5  ;;  %v3067_v15 = vpack.c.bf16 %v435_v12, %v433_v11  ;;  %v437_v17 = vld [vmem:[%s3563_s5 + $0x40] sm:$0xff]  ;;  %v439_v18 = vld [vmem:[%s3563_s5 + $0x50] sm:$0xff]  ;;  %v141_v31 = vsub.s32 0, %v140_v30  ;;  %v145_v41 = vsub.s32 1, %v140_v30 }
   0x5   :  { %2479 = vmatpush1.bf16.msra.mxu0 %v3048_v9  ;;  %2495 = vmatpush1.bf16.msra.mxu1 %v3048_v9  ;;  %v3071_v16 = vpack.c.bf16 %v440_v14, %v438_v13  ;;  %v41_v19 = vld [vmem:[%s3564_s0] sm:$0xff]  ;;  %v442_v20 = vld [vmem:[%s3563_s5 + $0x68] sm:$0xff]  ;;  %v444_v21 = vld [vmem:[%s3563_s5 + $0x78] sm:$0xff]  ;;  %v3093_v23 = vpack.c.bf16 %v439_v18, %v437_v17 }
   0x6   :  { %2481 = vmatprep.subr.bf16.mxu0 %v3050_v10  ;;  %2497 = vmatprep.subr.bf16.mxu1 %v3050_v10  ;;  %v181_v22 = vld [vmem:[%s3565_s1] sm:$0xff]  ;;  %v3097_v24 = vpack.c.bf16 %v444_v21, %v442_v20  ;;  %v443_v26 = vld [vmem:[%s3563_s5 + $0x70] sm:$0xff]  ;;  %v42_v27 = vld [vmem:[%s3564_s0 + $0x8] sm:$0xff] }
   0x7   :  { %60 = vperm.xlu0 %2758, %v41_v19   ;;  %v441_v25 = vld [vmem:[%s3563_s5 + $0x60] sm:$0xff]  ;;  %v182_v11 = vld [vmem:[%s3565_s1 + $0x8] sm:$0xff] }
   0x8   :  { %v3110_v28 = vpack.c.bf16 %v443_v26, %v441_v25  ;;  %v57_v32 = vld [vmem:[%s3566_s2] sm:$0x3]  ;;  %s2958_s2 = smov 64  }
   0x9   :  { %2483 = vmatpush1.bf16.msra.mxu0 %v3067_v15  ;;  %2499 = vmatpush1.bf16.msra.mxu1 %v3067_v15  ;;  %v197_v34 = vld [vmem:[%s3567_s3] sm:$0x3]  ;;  %v3135_v35 = vrot.slane %v57_v32, %v141_v31  ;;  %v3146_v44 = vrot.slane %v57_v32, %v145_v41 }
   0xa   :  { %2485 = vmatprep.subr.bf16.mxu0 %v3071_v16  ;;  %2501 = vmatprep.subr.bf16.mxu1 %v3071_v16  ;;  %v3137_v36 = vrot.slane %v197_v34, %v141_v31  ;;  %v353_v40 = vld [vmem:[%s3568_s4] sm:$0x3]  ;;  %v3148_v45 = vrot.slane %v197_v34, %v145_v41 }
   0xb   :  { %200 = vperm.xlu0 %2758, %v181_v22   ;;  %v3144_v43 = vrot.slane %v353_v40, %v141_v31  ;;  %v3153_v54 = vrot.slane %v353_v40, %v145_v41  ;;  %v43_v40 = vld [vmem:[%s3564_s0 + $0x10] sm:$0xff] }
   0xd   :  { %2487 = vmatpush1.bf16.msra.mxu0 %v3093_v23  ;;  %2503 = vmatpush1.bf16.msra.mxu1 %v3093_v23 }
   0xe   :  { %2489 = vmatprep.subr.bf16.mxu0 %v3097_v24  ;;  %2505 = vmatprep.subr.bf16.mxu1 %v3097_v24 }
   0xf   :  { %65 = vperm.xlu0 %2758, %v42_v27  }
  0x11   :  { %2491 = vmatpush1.bf16.msra.mxu0 %v3110_v28  ;;  %2507 = vmatpush1.bf16.msra.mxu1 %v3110_v28 }
  0x12   :  { %2509 = vmatprep.subr.bf16.mxu0 %v3036_v5  ;;  %2525 = vmatprep.subr.bf16.mxu1 %v3036_v5 }
  0x14   :  { %516 = vmatmul.mubr.f32.vlgmr.msra.gmra.mrb[0].mxu0 %v2956_v3 }
  0x15   :  { %2511 = vmatpush1.bf16.msra.mxu0 %v3048_v9  ;;  %721 = vmatprep.mubr.f32.mxu0 %v2956_v3 }
  0x16   :  { %2513 = vmatprep.subr.bf16.mxu0 %v3050_v10 }
  0x19   :  { %2515 = vmatpush1.bf16.msra.mxu0 %v3067_v15 }
  0x1a   :  { %2517 = vmatprep.subr.bf16.mxu0 %v3071_v16 }
  0x1d   :  { %2519 = vmatpush1.bf16.msra.mxu0 %v3093_v23 }
  0x1e   :  { %2521 = vmatprep.subr.bf16.mxu0 %v3097_v24 }
  0x21   :  { %2523 = vmatpush1.bf16.msra.mxu0 %v3110_v28 }
  0x22   :  { %2541 = vmatprep.subr.bf16.mxu0 %v3036_v5 }
  0x86   :  { %v61_v33 = vpop.permute.xlu0 %60 }
  0x87   :  { %v149_v38 = vmul.f32 %v3135_v35, %v61_v33  ;;  %v150_v50 = vmul.f32 %v3146_v44, %v61_v33 }
  0x8a   :  { %v201_v37 = vpop.permute.xlu0 %200 }
  0x8b   :  { %v289_v39 = vmul.f32 %v3137_v36, %v201_v37  ;;  %v290_v51 = vmul.f32 %v3148_v45, %v201_v37 }
  0x8d   :  { %v321_v42 = vadd.f32 %v289_v39, %v149_v38  ;;  %v322_v53 = vadd.f32 %v290_v51, %v150_v50 }
  0x8e   :  { %v66_v14 = vpop.permute.xlu0 %65 }
  0x8f   :  { %v365_v46 = vadd.f32 %v3144_v43, %v321_v42  ;;  %v366_v55 = vadd.f32 %v3153_v54, %v322_v53  ;;  %v151_v18 = vmul.f32 %v3135_v35, %v66_v14  ;;  %v152_v29 = vmul.f32 %v3146_v44, %v66_v14  ;;  %v183_v53 = vld [vmem:[%s3565_s1 + $0x10] sm:$0xff] }
  0xe7   :  { %v517_v47 = vpop.f32.mrb[0].mxu0 }
  0xe8   :  { %v522_v48 = vadd.f32 %v517_v47, %v365_v46  ;;  %v519_v49 = vpop.f32.mrb[1].mxu0 }
  0xe9   :  { %v523_v56 = vadd.f32 %v519_v49, %v366_v55 }
  0xea   :  { %v2369_v52 = vmul.f32 -1.442695, %v522_v48 }
  0xeb   :  { %v2370_v62 = vmul.f32 -1.442695, %v523_v56 }
  0xec   :  { %2760 = vpow2.f32 %v2369_v52 }
  0xed   :  { %2762 = vtanh.f32 %v523_v56 }
  0xf6   :  { %v2761_v57 = vpop.eup %2760 }
  0xf7   :  { %v530_v58 = vadd.f32 1.0, %v2761_v57  ;;  %v2763_v59 = vpop.eup %2762 }
  0xf9   :  { %2764 = vrcp.f32 %v530_v58 }
  0xfa   :  { %2766 = vpow2.f32 %v2370_v62 }
 0x103   :  { %v2765_v60 = vpop.eup %2764 }
 0x104   :  { %v538_v61 = vmul.f32 %v2765_v60, %v2763_v59  ;;  %v2767_v63 = vpop.eup %2766  ;;  %v537_v1 = vmul.f32 0.0, %v2765_v60 }
 0x105   :  { %v531_v0 = vadd.f32 1.0, %v2767_v63 }
 0x106   :  { %540 = vrot.lane.b32.xlu1 %v538_v61, %s2958_s2 }
 0x107   :  { %2768 = vrcp.f32 %v531_v0 }
 0x111   :  { %v2769_v6 = vpop.eup %2768 }
 0x178   :  { %v541_v2 = vpop.permute.xlu1 %540 }
 0x179   :  { %v543_v4 = vadd.f32 %v541_v2, %v537_v1 }
 0x17b   :  { %2770 = vtanh.f32 %v543_v4 }
 0x185   :  { %v2771_v7 = vpop.eup %2770 }
 0x186   :  { %v545_v8 = vmul.f32 %v2771_v7, %v2769_v6 }
 0x188   :  { %550 = vrot.lane.b32.xlu1 %v545_v8, %s2958_s2 }
 0x18c   :  { %205 = vperm.xlu1 %2759, %v182_v11  }
 0x1fa   :  { %v551_v12 = vpop.permute.xlu1 %550 }
 0x1fb   :  { %2371 = vmatmul.mubr.msk.f32.vlgmr.msra.gmra.mrb[0].mxu1 %vm447_vm0, %v551_v12 }
 0x1fc   :  { %2527 = vmatpush1.bf16.msra.mxu1 %v3048_v9  ;;  %824 = vmatprep.mubr.f32.mxu1 %v2956_v3 }
 0x1fd   :  { %2529 = vmatprep.subr.bf16.mxu1 %v3050_v10 }
 0x200   :  { %2531 = vmatpush1.bf16.msra.mxu1 %v3067_v15 }
 0x201   :  { %2533 = vmatprep.subr.bf16.mxu1 %v3071_v16 }
 0x204   :  { %2535 = vmatpush1.bf16.msra.mxu1 %v3093_v23 }
 0x205   :  { %2537 = vmatprep.subr.bf16.mxu1 %v3097_v24 }
 0x208   :  { %2539 = vmatpush1.bf16.msra.mxu1 %v3110_v28 }
 0x209   :  { %2557 = vmatprep.subr.bf16.mxu1 %v3036_v5 }
 0x20b   :  { %v206_v13 = vpop.permute.xlu1 %205 }
 0x20c   :  { %v291_v17 = vmul.f32 %v3137_v36, %v206_v13  ;;  %v292_v26 = vmul.f32 %v3148_v45, %v206_v13 }
 0x20e   :  { %v323_v19 = vadd.f32 %v291_v17, %v151_v18  ;;  %v324_v30 = vadd.f32 %v292_v26, %v152_v29  ;;  %v44_v18 = vld [vmem:[%s3564_s0 + $0x18] sm:$0xff] }
 0x210   :  { %v367_v20 = vadd.f32 %v3144_v43, %v323_v19  ;;  %v368_v31 = vadd.f32 %v3153_v54, %v324_v30 }
 0x2ce   :  { %v620_v21 = vpop.f32.mrb[0].mxu1 }
 0x2cf   :  { %v625_v22 = vadd.f32 %v620_v21, %v367_v20  ;;  %v622_v25 = vpop.f32.mrb[1].mxu1 }
 0x2d0   :  { %v626_v32 = vadd.f32 %v622_v25, %v368_v31  ;;  %v184_v31 = vld [vmem:[%s3565_s1 + $0x18] sm:$0xff] }
 0x2d1   :  { %v2372_v27 = vmul.f32 -1.442695, %v625_v22 }
 0x2d2   :  { %v2373_v41 = vmul.f32 -1.442695, %v626_v32 }
 0x2d3   :  { %2772 = vpow2.f32 %v2372_v27 }
 0x2d4   :  { %2774 = vtanh.f32 %v626_v32 }
 0x2dd   :  { %v2773_v33 = vpop.eup %2772 }
 0x2de   :  { %v633_v34 = vadd.f32 1.0, %v2773_v33  ;;  %v2775_v37 = vpop.eup %2774 }
 0x2e0   :  { %2776 = vrcp.f32 %v633_v34 }
 0x2e1   :  { %2778 = vpow2.f32 %v2373_v41 }
 0x2ea   :  { %v2777_v38 = vpop.eup %2776 }
 0x2eb   :  { %v641_v39 = vmul.f32 %v2777_v38, %v2775_v37  ;;  %v2779_v42 = vpop.eup %2778  ;;  %v640_v47 = vmul.f32 %v2777_v38, %v543_v4 }
 0x2ec   :  { %v634_v46 = vadd.f32 1.0, %v2779_v42 }
 0x2ed   :  { %643 = vrot.lane.b32.xlu0 %v641_v39, %s2958_s2 }
 0x2ee   :  { %2780 = vrcp.f32 %v634_v46 }
 0x2f1   :  { %70 = vperm.xlu0 %2758, %v43_v40  }
 0x2f8   :  { %v2781_v50 = vpop.eup %2780 }
 0x35f   :  { %v644_v48 = vpop.permute.xlu0 %643 }
 0x360   :  { %v646_v49 = vadd.f32 %v644_v48, %v640_v47 }
 0x362   :  { %2782 = vtanh.f32 %v646_v49 }
 0x36c   :  { %v2783_v51 = vpop.eup %2782 }
 0x36d   :  { %v648_v52 = vmul.f32 %v2783_v51, %v2781_v50 }
 0x36f   :  { %653 = vrot.lane.b32.xlu1 %v648_v52, %s2958_s2 }
 0x370   :  { %v71_v57 = vpop.permute.xlu0 %70 }
 0x371   :  { %v153_v59 = vmul.f32 %v3135_v35, %v71_v57  ;;  %v154_v4 = vmul.f32 %v3146_v44, %v71_v57 }
 0x373   :  { %210 = vperm.xlu1 %2759, %v183_v53  }
 0x3e1   :  { %v654_v55 = vpop.permute.xlu1 %653 }
 0x3e2   :  { %2374 = vmatmul.mubr.msk.f32.vlgmr.msra.gmra.mrb[2].mxu0 %vm447_vm0, %v654_v55 }
 0x3e3   :  { %2543 = vmatpush1.bf16.msra.mxu0 %v3048_v9  ;;  %927 = vmatprep.mubr.f32.mxu0 %v2956_v3 }
 0x3e4   :  { %2545 = vmatprep.subr.bf16.mxu0 %v3050_v10 }
 0x3e7   :  { %2547 = vmatpush1.bf16.msra.mxu0 %v3067_v15 }
 0x3e8   :  { %2549 = vmatprep.subr.bf16.mxu0 %v3071_v16 }
 0x3eb   :  { %2551 = vmatpush1.bf16.msra.mxu0 %v3093_v23 }
 0x3ec   :  { %2553 = vmatprep.subr.bf16.mxu0 %v3097_v24 }
 0x3ef   :  { %2555 = vmatpush1.bf16.msra.mxu0 %v3110_v28 }
 0x3f0   :  { %2573 = vmatprep.subr.bf16.mxu0 %v3036_v5 }
 0x3f2   :  { %v211_v56 = vpop.permute.xlu1 %210 }
 0x3f3   :  { %v293_v58 = vmul.f32 %v3137_v36, %v211_v56  ;;  %v294_v1 = vmul.f32 %v3148_v45, %v211_v56 }
 0x3f5   :  { %v325_v60 = vadd.f32 %v293_v58, %v153_v59  ;;  %v326_v6 = vadd.f32 %v294_v1, %v154_v4  ;;  %v45_v59 = vld [vmem:[%s3564_s0 + $0x20] sm:$0xff] }
 0x3f7   :  { %v369_v61 = vadd.f32 %v3144_v43, %v325_v60  ;;  %v370_v7 = vadd.f32 %v3153_v54, %v326_v6 }
 0x4b5   :  { %v723_v62 = vpop.f32.mrb[2].mxu0 }
 0x4b6   :  { %v728_v63 = vadd.f32 %v723_v62, %v369_v61  ;;  %v725_v0 = vpop.f32.mrb[3].mxu0 }
 0x4b7   :  { %v729_v8 = vadd.f32 %v725_v0, %v370_v7  ;;  %v185_v7 = vld [vmem:[%s3565_s1 + $0x20] sm:$0xff] }
 0x4b8   :  { %v2375_v2 = vmul.f32 -1.442695, %v728_v63 }
 0x4b9   :  { %v2376_v19 = vmul.f32 -1.442695, %v729_v8 }
 0x4ba   :  { %2784 = vpow2.f32 %v2375_v2 }
 0x4bb   :  { %2786 = vtanh.f32 %v729_v8 }
 0x4c4   :  { %v2785_v11 = vpop.eup %2784 }
 0x4c5   :  { %v736_v12 = vadd.f32 1.0, %v2785_v11  ;;  %v2787_v13 = vpop.eup %2786 }
 0x4c7   :  { %2788 = vrcp.f32 %v736_v12 }
 0x4c8   :  { %2790 = vpow2.f32 %v2376_v19 }
 0x4d1   :  { %v2789_v14 = vpop.eup %2788 }
 0x4d2   :  { %v744_v17 = vmul.f32 %v2789_v14, %v2787_v13  ;;  %v2791_v20 = vpop.eup %2790  ;;  %v743_v22 = vmul.f32 %v2789_v14, %v646_v49 }
 0x4d3   :  { %v737_v21 = vadd.f32 1.0, %v2791_v20 }
 0x4d4   :  { %746 = vrot.lane.b32.xlu0 %v744_v17, %s2958_s2 }
 0x4d5   :  { %2792 = vrcp.f32 %v737_v21 }
 0x4d8   :  { %75 = vperm.xlu0 %2758, %v44_v18  }
 0x4df   :  { %v2793_v27 = vpop.eup %2792 }
 0x546   :  { %v747_v25 = vpop.permute.xlu0 %746 }
 0x547   :  { %v749_v26 = vadd.f32 %v747_v25, %v743_v22 }
 0x549   :  { %2794 = vtanh.f32 %v749_v26 }
 0x553   :  { %v2795_v29 = vpop.eup %2794 }
 0x554   :  { %v751_v30 = vmul.f32 %v2795_v29, %v2793_v27 }
 0x556   :  { %756 = vrot.lane.b32.xlu1 %v751_v30, %s2958_s2 }
 0x557   :  { %v76_v34 = vpop.permute.xlu0 %75 }
 0x558   :  { %v155_v38 = vmul.f32 %v3135_v35, %v76_v34  ;;  %v156_v49 = vmul.f32 %v3146_v44, %v76_v34 }
 0x55a   :  { %215 = vperm.xlu1 %2759, %v184_v31  }
 0x5c8   :  { %v757_v32 = vpop.permute.xlu1 %756 }
 0x5c9   :  { %2377 = vmatmul.mubr.msk.f32.vlgmr.msra.gmra.mrb[2].mxu1 %vm447_vm0, %v757_v32 }
 0x5ca   :  { %2559 = vmatpush1.bf16.msra.mxu1 %v3048_v9  ;;  %1030 = vmatprep.mubr.f32.mxu1 %v2956_v3 }
 0x5cb   :  { %2561 = vmatprep.subr.bf16.mxu1 %v3050_v10 }
 0x5ce   :  { %2563 = vmatpush1.bf16.msra.mxu1 %v3067_v15 }
 0x5cf   :  { %2565 = vmatprep.subr.bf16.mxu1 %v3071_v16 }
 0x5d2   :  { %2567 = vmatpush1.bf16.msra.mxu1 %v3093_v23 }
 0x5d3   :  { %2569 = vmatprep.subr.bf16.mxu1 %v3097_v24 }
 0x5d6   :  { %2571 = vmatpush1.bf16.msra.mxu1 %v3110_v28 }
 0x5d7   :  { %2589 = vmatprep.subr.bf16.mxu1 %v3036_v5 }
 0x5d9   :  { %v216_v33 = vpop.permute.xlu1 %215 }
 0x5da   :  { %v295_v37 = vmul.f32 %v3137_v36, %v216_v33  ;;  %v296_v47 = vmul.f32 %v3148_v45, %v216_v33 }
 0x5dc   :  { %v327_v39 = vadd.f32 %v295_v37, %v155_v38  ;;  %v328_v50 = vadd.f32 %v296_v47, %v156_v49  ;;  %v46_v38 = vld [vmem:[%s3564_s0 + $0x28] sm:$0xff] }
 0x5de   :  { %v371_v40 = vadd.f32 %v3144_v43, %v327_v39  ;;  %v372_v51 = vadd.f32 %v3153_v54, %v328_v50 }
 0x69c   :  { %v826_v41 = vpop.f32.mrb[2].mxu1 }
 0x69d   :  { %v831_v42 = vadd.f32 %v826_v41, %v371_v40  ;;  %v828_v46 = vpop.f32.mrb[3].mxu1 }
 0x69e   :  { %v832_v52 = vadd.f32 %v828_v46, %v372_v51  ;;  %v186_v51 = vld [vmem:[%s3565_s1 + $0x28] sm:$0xff] }
 0x69f   :  { %v2378_v48 = vmul.f32 -1.442695, %v831_v42 }
 0x6a0   :  { %v2379_v60 = vmul.f32 -1.442695, %v832_v52 }
 0x6a1   :  { %2796 = vpow2.f32 %v2378_v48 }
 0x6a2   :  { %2798 = vtanh.f32 %v832_v52 }
 0x6ab   :  { %v2797_v53 = vpop.eup %2796 }
 0x6ac   :  { %v839_v55 = vadd.f32 1.0, %v2797_v53  ;;  %v2799_v56 = vpop.eup %2798 }
 0x6ae   :  { %2800 = vrcp.f32 %v839_v55 }
 0x6af   :  { %2802 = vpow2.f32 %v2379_v60 }
 0x6b8   :  { %v2801_v57 = vpop.eup %2800 }
 0x6b9   :  { %v847_v58 = vmul.f32 %v2801_v57, %v2799_v56  ;;  %v2803_v61 = vpop.eup %2802  ;;  %v846_v63 = vmul.f32 %v2801_v57, %v749_v26 }
 0x6ba   :  { %v840_v62 = vadd.f32 1.0, %v2803_v61 }
 0x6bb   :  { %849 = vrot.lane.b32.xlu0 %v847_v58, %s2958_s2 }
 0x6bc   :  { %2804 = vrcp.f32 %v840_v62 }
 0x6bf   :  { %80 = vperm.xlu0 %2758, %v45_v59  }
 0x6c6   :  { %v2805_v2 = vpop.eup %2804 }
 0x72d   :  { %v850_v0 = vpop.permute.xlu0 %849 }
 0x72e   :  { %v852_v1 = vadd.f32 %v850_v0, %v846_v63 }
 0x730   :  { %2806 = vtanh.f32 %v852_v1 }
 0x73a   :  { %v2807_v4 = vpop.eup %2806 }
 0x73b   :  { %v854_v6 = vmul.f32 %v2807_v4, %v2805_v2 }
 0x73d   :  { %859 = vrot.lane.b32.xlu1 %v854_v6, %s2958_s2 }
 0x73e   :  { %v81_v12 = vpop.permute.xlu0 %80 }
 0x73f   :  { %v157_v14 = vmul.f32 %v3135_v35, %v81_v12  ;;  %v158_v26 = vmul.f32 %v3146_v44, %v81_v12 }
 0x741   :  { %220 = vperm.xlu1 %2759, %v185_v7  }
 0x7af   :  { %v860_v8 = vpop.permute.xlu1 %859 }
 0x7b0   :  { %2380 = vmatmul.mubr.msk.f32.vlgmr.msra.gmra.mrb[4].mxu0 %vm447_vm0, %v860_v8 }
 0x7b1   :  { %2575 = vmatpush1.bf16.msra.mxu0 %v3048_v9  ;;  %1133 = vmatprep.mubr.f32.mxu0 %v2956_v3 }
 0x7b2   :  { %2577 = vmatprep.subr.bf16.mxu0 %v3050_v10 }
 0x7b5   :  { %2579 = vmatpush1.bf16.msra.mxu0 %v3067_v15 }
 0x7b6   :  { %2581 = vmatprep.subr.bf16.mxu0 %v3071_v16 }
 0x7b9   :  { %2583 = vmatpush1.bf16.msra.mxu0 %v3093_v23 }
 0x7ba   :  { %2585 = vmatprep.subr.bf16.mxu0 %v3097_v24 }
 0x7bd   :  { %2587 = vmatpush1.bf16.msra.mxu0 %v3110_v28 }
 0x7be   :  { %2605 = vmatprep.subr.bf16.mxu0 %v3036_v5 }
 0x7c0   :  { %v221_v11 = vpop.permute.xlu1 %220 }
 0x7c1   :  { %v297_v13 = vmul.f32 %v3137_v36, %v221_v11  ;;  %v298_v22 = vmul.f32 %v3148_v45, %v221_v11 }
 0x7c3   :  { %v329_v17 = vadd.f32 %v297_v13, %v157_v14  ;;  %v330_v27 = vadd.f32 %v298_v22, %v158_v26  ;;  %v47_v14 = vld [vmem:[%s3564_s0 + $0x30] sm:$0xff] }
 0x7c5   :  { %v373_v18 = vadd.f32 %v3144_v43, %v329_v17  ;;  %v374_v29 = vadd.f32 %v3153_v54, %v330_v27 }
 0x883   :  { %v929_v19 = vpop.f32.mrb[4].mxu0 }
 0x884   :  { %v934_v20 = vadd.f32 %v929_v19, %v373_v18  ;;  %v931_v21 = vpop.f32.mrb[5].mxu0 }
 0x885   :  { %v935_v30 = vadd.f32 %v931_v21, %v374_v29  ;;  %v187_v29 = vld [vmem:[%s3565_s1 + $0x30] sm:$0xff] }
 0x886   :  { %v2381_v25 = vmul.f32 -1.442695, %v934_v20 }
 0x887   :  { %v2382_v39 = vmul.f32 -1.442695, %v935_v30 }
 0x888   :  { %2808 = vpow2.f32 %v2381_v25 }
 0x889   :  { %2810 = vtanh.f32 %v935_v30 }
 0x892   :  { %v2809_v31 = vpop.eup %2808 }
 0x893   :  { %v942_v32 = vadd.f32 1.0, %v2809_v31  ;;  %v2811_v33 = vpop.eup %2810 }
 0x895   :  { %2812 = vrcp.f32 %v942_v32 }
 0x896   :  { %2814 = vpow2.f32 %v2382_v39 }
 0x89f   :  { %v2813_v34 = vpop.eup %2812 }
 0x8a0   :  { %v950_v37 = vmul.f32 %v2813_v34, %v2811_v33  ;;  %v2815_v40 = vpop.eup %2814  ;;  %v949_v42 = vmul.f32 %v2813_v34, %v852_v1 }
 0x8a1   :  { %v943_v41 = vadd.f32 1.0, %v2815_v40 }
 0x8a2   :  { %952 = vrot.lane.b32.xlu0 %v950_v37, %s2958_s2 }
 0x8a3   :  { %2816 = vrcp.f32 %v943_v41 }
 0x8a6   :  { %85 = vperm.xlu0 %2758, %v46_v38  }
 0x8ad   :  { %v2817_v48 = vpop.eup %2816 }
 0x914   :  { %v953_v46 = vpop.permute.xlu0 %952 }
 0x915   :  { %v955_v47 = vadd.f32 %v953_v46, %v949_v42 }
 0x917   :  { %2818 = vtanh.f32 %v955_v47 }
 0x921   :  { %v2819_v49 = vpop.eup %2818 }
 0x922   :  { %v957_v50 = vmul.f32 %v2819_v49, %v2817_v48 }
 0x924   :  { %962 = vrot.lane.b32.xlu1 %v957_v50, %s2958_s2 }
 0x925   :  { %v86_v55 = vpop.permute.xlu0 %85 }
 0x926   :  { %v159_v57 = vmul.f32 %v3135_v35, %v86_v55  ;;  %v160_v1 = vmul.f32 %v3146_v44, %v86_v55 }
 0x928   :  { %225 = vperm.xlu1 %2759, %v186_v51  }
 0x996   :  { %v963_v52 = vpop.permute.xlu1 %962 }
 0x997   :  { %2383 = vmatmul.mubr.msk.f32.vlgmr.msra.gmra.mrb[4].mxu1 %vm447_vm0, %v963_v52 }
 0x998   :  { %2591 = vmatpush1.bf16.msra.mxu1 %v3048_v9  ;;  %1236 = vmatprep.mubr.f32.mxu1 %v2956_v3 }
 0x999   :  { %2593 = vmatprep.subr.bf16.mxu1 %v3050_v10 }
 0x99c   :  { %2595 = vmatpush1.bf16.msra.mxu1 %v3067_v15 }
 0x99d   :  { %2597 = vmatprep.subr.bf16.mxu1 %v3071_v16 }
 0x9a0   :  { %2599 = vmatpush1.bf16.msra.mxu1 %v3093_v23 }
 0x9a1   :  { %2601 = vmatprep.subr.bf16.mxu1 %v3097_v24 }
 0x9a4   :  { %2603 = vmatpush1.bf16.msra.mxu1 %v3110_v28 }
 0x9a5   :  { %2621 = vmatprep.subr.bf16.mxu1 %v3036_v5 }
 0x9a7   :  { %v226_v53 = vpop.permute.xlu1 %225 }
 0x9a8   :  { %v299_v56 = vmul.f32 %v3137_v36, %v226_v53  ;;  %v300_v63 = vmul.f32 %v3148_v45, %v226_v53 }
 0x9aa   :  { %v331_v58 = vadd.f32 %v299_v56, %v159_v57  ;;  %v332_v2 = vadd.f32 %v300_v63, %v160_v1  ;;  %v48_v57 = vld [vmem:[%s3564_s0 + $0x38] sm:$0xff] }
 0x9ac   :  { %v375_v59 = vadd.f32 %v3144_v43, %v331_v58  ;;  %v376_v4 = vadd.f32 %v3153_v54, %v332_v2 }
 0xa6a   :  { %v1032_v60 = vpop.f32.mrb[4].mxu1 }
 0xa6b   :  { %v1037_v61 = vadd.f32 %v1032_v60, %v375_v59  ;;  %v1034_v62 = vpop.f32.mrb[5].mxu1 }
 0xa6c   :  { %v1038_v6 = vadd.f32 %v1034_v62, %v376_v4  ;;  %v188_v4 = vld [vmem:[%s3565_s1 + $0x38] sm:$0xff] }
 0xa6d   :  { %v2384_v0 = vmul.f32 -1.442695, %v1037_v61 }
 0xa6e   :  { %v2385_v17 = vmul.f32 -1.442695, %v1038_v6 }
 0xa6f   :  { %2820 = vpow2.f32 %v2384_v0 }
 0xa70   :  { %2822 = vtanh.f32 %v1038_v6 }
 0xa79   :  { %v2821_v7 = vpop.eup %2820 }
 0xa7a   :  { %v1045_v8 = vadd.f32 1.0, %v2821_v7  ;;  %v2823_v11 = vpop.eup %2822 }
 0xa7c   :  { %2824 = vrcp.f32 %v1045_v8 }
 0xa7d   :  { %2826 = vpow2.f32 %v2385_v17 }
 0xa86   :  { %v2825_v12 = vpop.eup %2824 }
 0xa87   :  { %v1053_v13 = vmul.f32 %v2825_v12, %v2823_v11  ;;  %v2827_v18 = vpop.eup %2826  ;;  %v1052_v20 = vmul.f32 %v2825_v12, %v955_v47 }
 0xa88   :  { %v1046_v19 = vadd.f32 1.0, %v2827_v18 }
 0xa89   :  { %1055 = vrot.lane.b32.xlu0 %v1053_v13, %s2958_s2 }
 0xa8a   :  { %2828 = vrcp.f32 %v1046_v19 }
 0xa8d   :  { %90 = vperm.xlu0 %2758, %v47_v14  }
 0xa94   :  { %v2829_v25 = vpop.eup %2828 }
 0xafb   :  { %v1056_v21 = vpop.permute.xlu0 %1055 }
 0xafc   :  { %v1058_v22 = vadd.f32 %v1056_v21, %v1052_v20 }
 0xafe   :  { %2830 = vtanh.f32 %v1058_v22 }
 0xb08   :  { %v2831_v26 = vpop.eup %2830 }
 0xb09   :  { %v1060_v27 = vmul.f32 %v2831_v26, %v2829_v25 }
 0xb0b   :  { %1065 = vrot.lane.b32.xlu1 %v1060_v27, %s2958_s2 }
 0xb0c   :  { %v91_v32 = vpop.permute.xlu0 %90 }
 0xb0d   :  { %v161_v34 = vmul.f32 %v3135_v35, %v91_v32  ;;  %v162_v47 = vmul.f32 %v3146_v44, %v91_v32 }
 0xb0f   :  { %230 = vperm.xlu1 %2759, %v187_v29  }
 0xb7d   :  { %v1066_v30 = vpop.permute.xlu1 %1065 }
 0xb7e   :  { %2386 = vmatmul.mubr.msk.f32.vlgmr.msra.gmra.mrb[6].mxu0 %vm447_vm0, %v1066_v30 }
 0xb7f   :  { %2607 = vmatpush1.bf16.msra.mxu0 %v3048_v9  ;;  %1339 = vmatprep.mubr.f32.mxu0 %v2956_v3 }
 0xb80   :  { %2609 = vmatprep.subr.bf16.mxu0 %v3050_v10 }
 0xb83   :  { %2611 = vmatpush1.bf16.msra.mxu0 %v3067_v15 }
 0xb84   :  { %2613 = vmatprep.subr.bf16.mxu0 %v3071_v16 }
 0xb87   :  { %2615 = vmatpush1.bf16.msra.mxu0 %v3093_v23 }
 0xb88   :  { %2617 = vmatprep.subr.bf16.mxu0 %v3097_v24 }
 0xb8b   :  { %2619 = vmatpush1.bf16.msra.mxu0 %v3110_v28 }
 0xb8c   :  { %2637 = vmatprep.subr.bf16.mxu0 %v3036_v5 }
 0xb8e   :  { %v231_v31 = vpop.permute.xlu1 %230 }
 0xb8f   :  { %v301_v33 = vmul.f32 %v3137_v36, %v231_v31  ;;  %v302_v42 = vmul.f32 %v3148_v45, %v231_v31 }
 0xb91   :  { %v333_v37 = vadd.f32 %v301_v33, %v161_v34  ;;  %v334_v48 = vadd.f32 %v302_v42, %v162_v47  ;;  %v49_v34 = vld [vmem:[%s3564_s0 + $0x40] sm:$0xff] }
 0xb93   :  { %v377_v38 = vadd.f32 %v3144_v43, %v333_v37  ;;  %v378_v49 = vadd.f32 %v3153_v54, %v334_v48 }
 0xc51   :  { %v1135_v39 = vpop.f32.mrb[6].mxu0 }
 0xc52   :  { %v1140_v40 = vadd.f32 %v1135_v39, %v377_v38  ;;  %v1137_v41 = vpop.f32.mrb[7].mxu0 }
 0xc53   :  { %v1141_v50 = vadd.f32 %v1137_v41, %v378_v49  ;;  %v189_v49 = vld [vmem:[%s3565_s1 + $0x40] sm:$0xff] }
 0xc54   :  { %v2387_v46 = vmul.f32 -1.442695, %v1140_v40 }
 0xc55   :  { %v2388_v58 = vmul.f32 -1.442695, %v1141_v50 }
 0xc56   :  { %2832 = vpow2.f32 %v2387_v46 }
 0xc57   :  { %2834 = vtanh.f32 %v1141_v50 }
 0xc60   :  { %v2833_v51 = vpop.eup %2832 }
 0xc61   :  { %v1148_v52 = vadd.f32 1.0, %v2833_v51  ;;  %v2835_v53 = vpop.eup %2834 }
 0xc63   :  { %2836 = vrcp.f32 %v1148_v52 }
 0xc64   :  { %2838 = vpow2.f32 %v2388_v58 }
 0xc6d   :  { %v2837_v55 = vpop.eup %2836 }
 0xc6e   :  { %v1156_v56 = vmul.f32 %v2837_v55, %v2835_v53  ;;  %v2839_v59 = vpop.eup %2838  ;;  %v1155_v61 = vmul.f32 %v2837_v55, %v1058_v22 }
 0xc6f   :  { %v1149_v60 = vadd.f32 1.0, %v2839_v59 }
 0xc70   :  { %1158 = vrot.lane.b32.xlu0 %v1156_v56, %s2958_s2 }
 0xc71   :  { %2840 = vrcp.f32 %v1149_v60 }
 0xc74   :  { %95 = vperm.xlu0 %2758, %v48_v57  }
 0xc7b   :  { %v2841_v0 = vpop.eup %2840 }
 0xce2   :  { %v1159_v62 = vpop.permute.xlu0 %1158 }
 0xce3   :  { %v1161_v63 = vadd.f32 %v1159_v62, %v1155_v61 }
 0xce5   :  { %2842 = vtanh.f32 %v1161_v63 }
 0xcef   :  { %v2843_v1 = vpop.eup %2842 }
 0xcf0   :  { %v1163_v2 = vmul.f32 %v2843_v1, %v2841_v0 }
 0xcf2   :  { %1168 = vrot.lane.b32.xlu1 %v1163_v2, %s2958_s2 }
 0xcf3   :  { %v96_v8 = vpop.permute.xlu0 %95 }
 0xcf4   :  { %v163_v12 = vmul.f32 %v3135_v35, %v96_v8  ;;  %v164_v22 = vmul.f32 %v3146_v44, %v96_v8 }
 0xcf6   :  { %235 = vperm.xlu1 %2759, %v188_v4  }
 0xd64   :  { %v1169_v6 = vpop.permute.xlu1 %1168 }
 0xd65   :  { %2389 = vmatmul.mubr.msk.f32.vlgmr.msra.gmra.mrb[6].mxu1 %vm447_vm0, %v1169_v6 }
 0xd66   :  { %2623 = vmatpush1.bf16.msra.mxu1 %v3048_v9  ;;  %1442 = vmatprep.mubr.f32.mxu1 %v2956_v3 }
 0xd67   :  { %2625 = vmatprep.subr.bf16.mxu1 %v3050_v10 }
 0xd6a   :  { %2627 = vmatpush1.bf16.msra.mxu1 %v3067_v15 }
 0xd6b   :  { %2629 = vmatprep.subr.bf16.mxu1 %v3071_v16 }
 0xd6e   :  { %2631 = vmatpush1.bf16.msra.mxu1 %v3093_v23 }
 0xd6f   :  { %2633 = vmatprep.subr.bf16.mxu1 %v3097_v24 }
 0xd72   :  { %2635 = vmatpush1.bf16.msra.mxu1 %v3110_v28 }
 0xd73   :  { %2653 = vmatprep.subr.bf16.mxu1 %v3036_v5 }
 0xd75   :  { %v236_v7 = vpop.permute.xlu1 %235 }
 0xd76   :  { %v303_v11 = vmul.f32 %v3137_v36, %v236_v7  ;;  %v304_v20 = vmul.f32 %v3148_v45, %v236_v7 }
 0xd78   :  { %v335_v13 = vadd.f32 %v303_v11, %v163_v12  ;;  %v336_v25 = vadd.f32 %v304_v20, %v164_v22  ;;  %v50_v12 = vld [vmem:[%s3564_s0 + $0x48] sm:$0xff] }
 0xd7a   :  { %v379_v14 = vadd.f32 %v3144_v43, %v335_v13  ;;  %v380_v26 = vadd.f32 %v3153_v54, %v336_v25 }
 0xe38   :  { %v1238_v17 = vpop.f32.mrb[6].mxu1 }
 0xe39   :  { %v1243_v18 = vadd.f32 %v1238_v17, %v379_v14  ;;  %v1240_v19 = vpop.f32.mrb[7].mxu1 }
 0xe3a   :  { %v1244_v27 = vadd.f32 %v1240_v19, %v380_v26  ;;  %v190_v26 = vld [vmem:[%s3565_s1 + $0x48] sm:$0xff] }
 0xe3b   :  { %v2390_v21 = vmul.f32 -1.442695, %v1243_v18 }
 0xe3c   :  { %v2391_v37 = vmul.f32 -1.442695, %v1244_v27 }
 0xe3d   :  { %2844 = vpow2.f32 %v2390_v21 }
 0xe3e   :  { %2846 = vtanh.f32 %v1244_v27 }
 0xe47   :  { %v2845_v29 = vpop.eup %2844 }
 0xe48   :  { %v1251_v30 = vadd.f32 1.0, %v2845_v29  ;;  %v2847_v31 = vpop.eup %2846 }
 0xe4a   :  { %2848 = vrcp.f32 %v1251_v30 }
 0xe4b   :  { %2850 = vpow2.f32 %v2391_v37 }
 0xe54   :  { %v2849_v32 = vpop.eup %2848 }
 0xe55   :  { %v1259_v33 = vmul.f32 %v2849_v32, %v2847_v31  ;;  %v2851_v38 = vpop.eup %2850  ;;  %v1258_v40 = vmul.f32 %v2849_v32, %v1161_v63 }
 0xe56   :  { %v1252_v39 = vadd.f32 1.0, %v2851_v38 }
 0xe57   :  { %1261 = vrot.lane.b32.xlu0 %v1259_v33, %s2958_s2 }
 0xe58   :  { %2852 = vrcp.f32 %v1252_v39 }
 0xe5b   :  { %100 = vperm.xlu0 %2758, %v49_v34  }
 0xe62   :  { %v2853_v46 = vpop.eup %2852 }
 0xec9   :  { %v1262_v41 = vpop.permute.xlu0 %1261 }
 0xeca   :  { %v1264_v42 = vadd.f32 %v1262_v41, %v1258_v40 }
 0xecc   :  { %2854 = vtanh.f32 %v1264_v42 }
 0xed6   :  { %v2855_v47 = vpop.eup %2854 }
 0xed7   :  { %v1266_v48 = vmul.f32 %v2855_v47, %v2853_v46 }
 0xed9   :  { %1271 = vrot.lane.b32.xlu1 %v1266_v48, %s2958_s2 }
 0xeda   :  { %v101_v52 = vpop.permute.xlu0 %100 }
 0xedb   :  { %v165_v55 = vmul.f32 %v3135_v35, %v101_v52  ;;  %v166_v63 = vmul.f32 %v3146_v44, %v101_v52 }
 0xedd   :  { %240 = vperm.xlu1 %2759, %v189_v49  }
 0xf4b   :  { %v1272_v50 = vpop.permute.xlu1 %1271 }
 0xf4c   :  { %2392 = vmatmul.mubr.msk.f32.vlgmr.msra.gmra.mrb[8].mxu0 %vm447_vm0, %v1272_v50 }
 0xf4d   :  { %2639 = vmatpush1.bf16.msra.mxu0 %v3048_v9  ;;  %1545 = vmatprep.mubr.f32.mxu0 %v2956_v3 }
 0xf4e   :  { %2641 = vmatprep.subr.bf16.mxu0 %v3050_v10 }
 0xf51   :  { %2643 = vmatpush1.bf16.msra.mxu0 %v3067_v15 }
 0xf52   :  { %2645 = vmatprep.subr.bf16.mxu0 %v3071_v16 }
 0xf55   :  { %2647 = vmatpush1.bf16.msra.mxu0 %v3093_v23 }
 0xf56   :  { %2649 = vmatprep.subr.bf16.mxu0 %v3097_v24 }
 0xf59   :  { %2651 = vmatpush1.bf16.msra.mxu0 %v3110_v28 }
 0xf5a   :  { %2669 = vmatprep.subr.bf16.mxu0 %v3036_v5 }
 0xf5c   :  { %v241_v51 = vpop.permute.xlu1 %240 }
 0xf5d   :  { %v305_v53 = vmul.f32 %v3137_v36, %v241_v51  ;;  %v306_v61 = vmul.f32 %v3148_v45, %v241_v51 }
 0xf5f   :  { %v337_v56 = vadd.f32 %v305_v53, %v165_v55  ;;  %v338_v0 = vadd.f32 %v306_v61, %v166_v63  ;;  %v51_v55 = vld [vmem:[%s3564_s0 + $0x50] sm:$0xff] }
 0xf61   :  { %v381_v57 = vadd.f32 %v3144_v43, %v337_v56  ;;  %v382_v1 = vadd.f32 %v3153_v54, %v338_v0 }
0x101f   :  { %v1341_v58 = vpop.f32.mrb[8].mxu0 }
0x1020   :  { %v1346_v59 = vadd.f32 %v1341_v58, %v381_v57  ;;  %v1343_v60 = vpop.f32.mrb[9].mxu0 }
0x1021   :  { %v1347_v2 = vadd.f32 %v1343_v60, %v382_v1  ;;  %v191_v1 = vld [vmem:[%s3565_s1 + $0x50] sm:$0xff] }
0x1022   :  { %v2393_v62 = vmul.f32 -1.442695, %v1346_v59 }
0x1023   :  { %v2394_v13 = vmul.f32 -1.442695, %v1347_v2 }
0x1024   :  { %2856 = vpow2.f32 %v2393_v62 }
0x1025   :  { %2858 = vtanh.f32 %v1347_v2 }
0x102e   :  { %v2857_v4 = vpop.eup %2856 }
0x102f   :  { %v1354_v6 = vadd.f32 1.0, %v2857_v4  ;;  %v2859_v7 = vpop.eup %2858 }
0x1031   :  { %2860 = vrcp.f32 %v1354_v6 }
0x1032   :  { %2862 = vpow2.f32 %v2394_v13 }
0x103b   :  { %v2861_v8 = vpop.eup %2860 }
0x103c   :  { %v1362_v11 = vmul.f32 %v2861_v8, %v2859_v7  ;;  %v2863_v14 = vpop.eup %2862  ;;  %v1361_v18 = vmul.f32 %v2861_v8, %v1264_v42 }
0x103d   :  { %v1355_v17 = vadd.f32 1.0, %v2863_v14 }
0x103e   :  { %1364 = vrot.lane.b32.xlu0 %v1362_v11, %s2958_s2 }
0x103f   :  { %2864 = vrcp.f32 %v1355_v17 }
0x1042   :  { %105 = vperm.xlu0 %2758, %v50_v12  }
0x1049   :  { %v2865_v21 = vpop.eup %2864 }
0x10b0   :  { %v1365_v19 = vpop.permute.xlu0 %1364 }
0x10b1   :  { %v1367_v20 = vadd.f32 %v1365_v19, %v1361_v18 }
0x10b3   :  { %2866 = vtanh.f32 %v1367_v20 }
0x10bd   :  { %v2867_v22 = vpop.eup %2866 }
0x10be   :  { %v1369_v25 = vmul.f32 %v2867_v22, %v2865_v21 }
0x10c0   :  { %1374 = vrot.lane.b32.xlu1 %v1369_v25, %s2958_s2 }
0x10c1   :  { %v106_v30 = vpop.permute.xlu0 %105 }
0x10c2   :  { %v167_v32 = vmul.f32 %v3135_v35, %v106_v30  ;;  %v168_v42 = vmul.f32 %v3146_v44, %v106_v30 }
0x10c4   :  { %245 = vperm.xlu1 %2759, %v190_v26  }
0x1132   :  { %v1375_v27 = vpop.permute.xlu1 %1374 }
0x1133   :  { %2395 = vmatmul.mubr.msk.f32.vlgmr.msra.gmra.mrb[8].mxu1 %vm447_vm0, %v1375_v27 }
0x1134   :  { %2655 = vmatpush1.bf16.msra.mxu1 %v3048_v9  ;;  %1648 = vmatprep.mubr.f32.mxu1 %v2956_v3 }
0x1135   :  { %2657 = vmatprep.subr.bf16.mxu1 %v3050_v10 }
0x1138   :  { %2659 = vmatpush1.bf16.msra.mxu1 %v3067_v15 }
0x1139   :  { %2661 = vmatprep.subr.bf16.mxu1 %v3071_v16 }
0x113c   :  { %2663 = vmatpush1.bf16.msra.mxu1 %v3093_v23 }
0x113d   :  { %2665 = vmatprep.subr.bf16.mxu1 %v3097_v24 }
0x1140   :  { %2667 = vmatpush1.bf16.msra.mxu1 %v3110_v28 }
0x1141   :  { %2685 = vmatprep.subr.bf16.mxu1 %v3036_v5 }
0x1143   :  { %v246_v29 = vpop.permute.xlu1 %245 }
0x1144   :  { %v307_v31 = vmul.f32 %v3137_v36, %v246_v29  ;;  %v308_v40 = vmul.f32 %v3148_v45, %v246_v29 }
0x1146   :  { %v339_v33 = vadd.f32 %v307_v31, %v167_v32  ;;  %v340_v46 = vadd.f32 %v308_v40, %v168_v42  ;;  %v52_v32 = vld [vmem:[%s3564_s0 + $0x58] sm:$0xff] }
0x1148   :  { %v383_v34 = vadd.f32 %v3144_v43, %v339_v33  ;;  %v384_v47 = vadd.f32 %v3153_v54, %v340_v46 }
0x1206   :  { %v1444_v37 = vpop.f32.mrb[8].mxu1 }
0x1207   :  { %v1449_v38 = vadd.f32 %v1444_v37, %v383_v34  ;;  %v1446_v39 = vpop.f32.mrb[9].mxu1 }
0x1208   :  { %v1450_v48 = vadd.f32 %v1446_v39, %v384_v47  ;;  %v192_v47 = vld [vmem:[%s3565_s1 + $0x58] sm:$0xff] }
0x1209   :  { %v2396_v41 = vmul.f32 -1.442695, %v1449_v38 }
0x120a   :  { %v2397_v56 = vmul.f32 -1.442695, %v1450_v48 }
0x120b   :  { %2868 = vpow2.f32 %v2396_v41 }
0x120c   :  { %2870 = vtanh.f32 %v1450_v48 }
0x1215   :  { %v2869_v49 = vpop.eup %2868 }
0x1216   :  { %v1457_v50 = vadd.f32 1.0, %v2869_v49  ;;  %v2871_v51 = vpop.eup %2870 }
0x1218   :  { %2872 = vrcp.f32 %v1457_v50 }
0x1219   :  { %2874 = vpow2.f32 %v2397_v56 }
0x1222   :  { %v2873_v52 = vpop.eup %2872 }
0x1223   :  { %v1465_v53 = vmul.f32 %v2873_v52, %v2871_v51  ;;  %v2875_v57 = vpop.eup %2874  ;;  %v1464_v59 = vmul.f32 %v2873_v52, %v1367_v20 }
0x1224   :  { %v1458_v58 = vadd.f32 1.0, %v2875_v57 }
0x1225   :  { %1467 = vrot.lane.b32.xlu0 %v1465_v53, %s2958_s2 }
0x1226   :  { %2876 = vrcp.f32 %v1458_v58 }
0x1229   :  { %110 = vperm.xlu0 %2758, %v51_v55  }
0x1230   :  { %v2877_v62 = vpop.eup %2876 }
0x1297   :  { %v1468_v60 = vpop.permute.xlu0 %1467 }
0x1298   :  { %v1470_v61 = vadd.f32 %v1468_v60, %v1464_v59 }
0x129a   :  { %2878 = vtanh.f32 %v1470_v61 }
0x12a4   :  { %v2879_v63 = vpop.eup %2878 }
0x12a5   :  { %v1472_v0 = vmul.f32 %v2879_v63, %v2877_v62 }
0x12a7   :  { %1477 = vrot.lane.b32.xlu1 %v1472_v0, %s2958_s2 }
0x12a8   :  { %v111_v6 = vpop.permute.xlu0 %110 }
0x12a9   :  { %v169_v8 = vmul.f32 %v3135_v35, %v111_v6  ;;  %v170_v20 = vmul.f32 %v3146_v44, %v111_v6 }
0x12ab   :  { %250 = vperm.xlu1 %2759, %v191_v1  }
0x1319   :  { %v1478_v2 = vpop.permute.xlu1 %1477 }
0x131a   :  { %2398 = vmatmul.mubr.msk.f32.vlgmr.msra.gmra.mrb[10].mxu0 %vm447_vm0, %v1478_v2 }
0x131b   :  { %2671 = vmatpush1.bf16.msra.mxu0 %v3048_v9  ;;  %1751 = vmatprep.mubr.f32.mxu0 %v2956_v3 }
0x131c   :  { %2673 = vmatprep.subr.bf16.mxu0 %v3050_v10 }
0x131f   :  { %2675 = vmatpush1.bf16.msra.mxu0 %v3067_v15 }
0x1320   :  { %2677 = vmatprep.subr.bf16.mxu0 %v3071_v16 }
0x1323   :  { %2679 = vmatpush1.bf16.msra.mxu0 %v3093_v23 }
0x1324   :  { %2681 = vmatprep.subr.bf16.mxu0 %v3097_v24 }
0x1327   :  { %2683 = vmatpush1.bf16.msra.mxu0 %v3110_v28 }
0x1328   :  { %2701 = vmatprep.subr.bf16.mxu0 %v3036_v5 }
0x132a   :  { %v251_v4 = vpop.permute.xlu1 %250 }
0x132b   :  { %v309_v7 = vmul.f32 %v3137_v36, %v251_v4  ;;  %v310_v18 = vmul.f32 %v3148_v45, %v251_v4 }
0x132d   :  { %v341_v11 = vadd.f32 %v309_v7, %v169_v8  ;;  %v342_v21 = vadd.f32 %v310_v18, %v170_v20  ;;  %v53_v7 = vld [vmem:[%s3564_s0 + $0x60] sm:$0xff] }
0x132f   :  { %v385_v12 = vadd.f32 %v3144_v43, %v341_v11  ;;  %v386_v22 = vadd.f32 %v3153_v54, %v342_v21  ;;  %v193_v21 = vld [vmem:[%s3565_s1 + $0x60] sm:$0xff] }
0x13ed   :  { %v1547_v13 = vpop.f32.mrb[10].mxu0 }
0x13ee   :  { %v1552_v14 = vadd.f32 %v1547_v13, %v385_v12  ;;  %v1549_v17 = vpop.f32.mrb[11].mxu0 }
0x13ef   :  { %v1553_v25 = vadd.f32 %v1549_v17, %v386_v22 }
0x13f0   :  { %v2399_v19 = vmul.f32 -1.442695, %v1552_v14 }
0x13f1   :  { %v2400_v33 = vmul.f32 -1.442695, %v1553_v25 }
0x13f2   :  { %2880 = vpow2.f32 %v2399_v19 }
0x13f3   :  { %2882 = vtanh.f32 %v1553_v25 }
0x13fc   :  { %v2881_v26 = vpop.eup %2880 }
0x13fd   :  { %v1560_v27 = vadd.f32 1.0, %v2881_v26  ;;  %v2883_v29 = vpop.eup %2882 }
0x13ff   :  { %2884 = vrcp.f32 %v1560_v27 }
0x1400   :  { %2886 = vpow2.f32 %v2400_v33 }
0x1409   :  { %v2885_v30 = vpop.eup %2884 }
0x140a   :  { %v1568_v31 = vmul.f32 %v2885_v30, %v2883_v29  ;;  %v2887_v34 = vpop.eup %2886  ;;  %v1567_v38 = vmul.f32 %v2885_v30, %v1470_v61 }
0x140b   :  { %v1561_v37 = vadd.f32 1.0, %v2887_v34 }
0x140c   :  { %1570 = vrot.lane.b32.xlu0 %v1568_v31, %s2958_s2 }
0x140d   :  { %2888 = vrcp.f32 %v1561_v37 }
0x1410   :  { %115 = vperm.xlu0 %2758, %v52_v32  }
0x1417   :  { %v2889_v41 = vpop.eup %2888 }
0x147e   :  { %v1571_v39 = vpop.permute.xlu0 %1570 }
0x147f   :  { %v1573_v40 = vadd.f32 %v1571_v39, %v1567_v38 }
0x1481   :  { %2890 = vtanh.f32 %v1573_v40 }
0x148b   :  { %v2891_v42 = vpop.eup %2890 }
0x148c   :  { %v1575_v46 = vmul.f32 %v2891_v42, %v2889_v41 }
0x148e   :  { %1580 = vrot.lane.b32.xlu1 %v1575_v46, %s2958_s2 }
0x148f   :  { %v116_v50 = vpop.permute.xlu0 %115 }
0x1490   :  { %v171_v52 = vmul.f32 %v3135_v35, %v116_v50  ;;  %v172_v61 = vmul.f32 %v3146_v44, %v116_v50 }
0x1492   :  { %255 = vperm.xlu1 %2759, %v192_v47  }
0x1500   :  { %v1581_v48 = vpop.permute.xlu1 %1580 }
0x1501   :  { %2401 = vmatmul.mubr.msk.f32.vlgmr.msra.gmra.mrb[10].mxu1 %vm447_vm0, %v1581_v48 }
0x1502   :  { %2687 = vmatpush1.bf16.msra.mxu1 %v3048_v9  ;;  %1854 = vmatprep.mubr.f32.mxu1 %v2956_v3 }
0x1503   :  { %2689 = vmatprep.subr.bf16.mxu1 %v3050_v10 }
0x1506   :  { %2691 = vmatpush1.bf16.msra.mxu1 %v3067_v15 }
0x1507   :  { %2693 = vmatprep.subr.bf16.mxu1 %v3071_v16 }
0x150a   :  { %2695 = vmatpush1.bf16.msra.mxu1 %v3093_v23 }
0x150b   :  { %2697 = vmatprep.subr.bf16.mxu1 %v3097_v24 }
0x150e   :  { %2699 = vmatpush1.bf16.msra.mxu1 %v3110_v28 }
0x150f   :  { %2717 = vmatprep.subr.bf16.mxu1 %v3036_v5 }
0x1511   :  { %v256_v49 = vpop.permute.xlu1 %255 }
0x1512   :  { %v311_v51 = vmul.f32 %v3137_v36, %v256_v49  ;;  %v312_v59 = vmul.f32 %v3148_v45, %v256_v49 }
0x1514   :  { %v343_v53 = vadd.f32 %v311_v51, %v171_v52  ;;  %v344_v62 = vadd.f32 %v312_v59, %v172_v61  ;;  %v54_v51 = vld [vmem:[%s3564_s0 + $0x68] sm:$0xff] }
0x1516   :  { %v387_v55 = vadd.f32 %v3144_v43, %v343_v53  ;;  %v388_v5 = vadd.f32 %v3153_v54, %v344_v62  ;;  %v194_v62 = vld [vmem:[%s3565_s1 + $0x68] sm:$0xff] }
0x15d4   :  { %v1650_v56 = vpop.f32.mrb[10].mxu1 }
0x15d5   :  { %v1655_v57 = vadd.f32 %v1650_v56, %v387_v55  ;;  %v1652_v58 = vpop.f32.mrb[11].mxu1 }
0x15d6   :  { %v1656_v63 = vadd.f32 %v1652_v58, %v388_v5 }
0x15d7   :  { %v2402_v60 = vmul.f32 -1.442695, %v1655_v57 }
0x15d8   :  { %v2403_v8 = vmul.f32 -1.442695, %v1656_v63 }
0x15d9   :  { %2892 = vpow2.f32 %v2402_v60 }
0x15da   :  { %2894 = vtanh.f32 %v1656_v63 }
0x15e3   :  { %v2893_v0 = vpop.eup %2892 }
0x15e4   :  { %v1663_v1 = vadd.f32 1.0, %v2893_v0  ;;  %v2895_v2 = vpop.eup %2894 }
0x15e6   :  { %2896 = vrcp.f32 %v1663_v1 }
0x15e7   :  { %2898 = vpow2.f32 %v2403_v8 }
0x15f0   :  { %v2897_v4 = vpop.eup %2896 }
0x15f1   :  { %v1671_v6 = vmul.f32 %v2897_v4, %v2895_v2  ;;  %v2899_v11 = vpop.eup %2898  ;;  %v1670_v13 = vmul.f32 %v2897_v4, %v1573_v40 }
0x15f2   :  { %v1664_v12 = vadd.f32 1.0, %v2899_v11 }
0x15f3   :  { %1673 = vrot.lane.b32.xlu0 %v1671_v6, %s2958_s2 }
0x15f4   :  { %2900 = vrcp.f32 %v1664_v12 }
0x15f7   :  { %120 = vperm.xlu0 %2758, %v53_v7  }
0x15fe   :  { %v2901_v18 = vpop.eup %2900 }
0x1665   :  { %v1674_v14 = vpop.permute.xlu0 %1673 }
0x1666   :  { %v1676_v17 = vadd.f32 %v1674_v14, %v1670_v13 }
0x1668   :  { %2902 = vtanh.f32 %v1676_v17 }
0x1672   :  { %v2903_v19 = vpop.eup %2902 }
0x1673   :  { %v1678_v20 = vmul.f32 %v2903_v19, %v2901_v18  ;;  %v55_v18 = vld [vmem:[%s3564_s0 + $0x70] sm:$0xff] }
0x1675   :  { %1683 = vrot.lane.b32.xlu1 %v1678_v20, %s2958_s2 }
0x1676   :  { %v121_v26 = vpop.permute.xlu0 %120 }
0x1677   :  { %v173_v29 = vmul.f32 %v3135_v35, %v121_v26  ;;  %v174_v39 = vmul.f32 %v3146_v44, %v121_v26 }
0x1679   :  { %260 = vperm.xlu1 %2759, %v193_v21  }
0x16e7   :  { %v1684_v22 = vpop.permute.xlu1 %1683 }
0x16e8   :  { %2404 = vmatmul.mubr.msk.f32.vlgmr.msra.gmra.mrb[12].mxu0 %vm447_vm0, %v1684_v22 }
0x16e9   :  { %2703 = vmatpush1.bf16.msra.mxu0 %v3048_v9  ;;  %1957 = vmatprep.mubr.f32.mxu0 %v2956_v3 }
0x16ea   :  { %2705 = vmatprep.subr.bf16.mxu0 %v3050_v10 }
0x16ed   :  { %2707 = vmatpush1.bf16.msra.mxu0 %v3067_v15 }
0x16ee   :  { %2709 = vmatprep.subr.bf16.mxu0 %v3071_v16 }
0x16f1   :  { %2711 = vmatpush1.bf16.msra.mxu0 %v3093_v23 }
0x16f2   :  { %2713 = vmatprep.subr.bf16.mxu0 %v3097_v24 }
0x16f5   :  { %2715 = vmatpush1.bf16.msra.mxu0 %v3110_v28 }
0x16f8   :  { %v261_v25 = vpop.permute.xlu1 %260 }
0x16f9   :  { %v313_v27 = vmul.f32 %v3137_v36, %v261_v25  ;;  %v314_v37 = vmul.f32 %v3148_v45, %v261_v25 }
0x16fb   :  { %v345_v30 = vadd.f32 %v313_v27, %v173_v29  ;;  %v346_v40 = vadd.f32 %v314_v37, %v174_v39 }
0x16fd   :  { %v389_v31 = vadd.f32 %v3144_v43, %v345_v30  ;;  %v390_v41 = vadd.f32 %v3153_v54, %v346_v40 }
0x17bb   :  { %v1753_v32 = vpop.f32.mrb[12].mxu0 }
0x17bc   :  { %v1758_v33 = vadd.f32 %v1753_v32, %v389_v31  ;;  %v1755_v34 = vpop.f32.mrb[13].mxu0  ;;  %v195_v31 = vld [vmem:[%s3565_s1 + $0x70] sm:$0xff] }
0x17bd   :  { %v1759_v42 = vadd.f32 %v1755_v34, %v390_v41 }
0x17be   :  { %v2405_v38 = vmul.f32 -1.442695, %v1758_v33 }
0x17bf   :  { %v2406_v52 = vmul.f32 -1.442695, %v1759_v42 }
0x17c0   :  { %2904 = vpow2.f32 %v2405_v38 }
0x17c1   :  { %2906 = vtanh.f32 %v1759_v42 }
0x17ca   :  { %v2905_v46 = vpop.eup %2904 }
0x17cb   :  { %v1766_v47 = vadd.f32 1.0, %v2905_v46  ;;  %v2907_v48 = vpop.eup %2906 }
0x17cd   :  { %2908 = vrcp.f32 %v1766_v47 }
0x17ce   :  { %2910 = vpow2.f32 %v2406_v52 }
0x17d7   :  { %v2909_v49 = vpop.eup %2908 }
0x17d8   :  { %v1774_v50 = vmul.f32 %v2909_v49, %v2907_v48  ;;  %v2911_v53 = vpop.eup %2910  ;;  %v1773_v56 = vmul.f32 %v2909_v49, %v1676_v17 }
0x17d9   :  { %v1767_v55 = vadd.f32 1.0, %v2911_v53 }
0x17da   :  { %1776 = vrot.lane.b32.xlu0 %v1774_v50, %s2958_s2 }
0x17db   :  { %2912 = vrcp.f32 %v1767_v55 }
0x17de   :  { %125 = vperm.xlu0 %2758, %v54_v51  }
0x17e5   :  { %v2913_v59 = vpop.eup %2912 }
0x184c   :  { %v1777_v57 = vpop.permute.xlu0 %1776 }
0x184d   :  { %v1779_v58 = vadd.f32 %v1777_v57, %v1773_v56 }
0x184f   :  { %2914 = vtanh.f32 %v1779_v58 }
0x1859   :  { %v2915_v60 = vpop.eup %2914 }
0x185a   :  { %v1781_v61 = vmul.f32 %v2915_v60, %v2913_v59  ;;  %v56_v59 = vld [vmem:[%s3564_s0 + $0x78] sm:$0xff] }
0x185c   :  { %1786 = vrot.lane.b32.xlu1 %v1781_v61, %s2958_s2 }
0x185d   :  { %v126_v0 = vpop.permute.xlu0 %125 }
0x1860   :  { %265 = vperm.xlu1 %2759, %v194_v62  }
0x18ce   :  { %v1787_v5 = vpop.permute.xlu1 %1786 }
0x18cf   :  { %2407 = vmatmul.mubr.msk.f32.vlgmr.msra.gmra.mrb[12].mxu1 %vm447_vm0, %v1787_v5 }
0x18d0   :  { %2719 = vmatpush1.bf16.msra.mxu1 %v3048_v9  ;;  %2060 = vmatprep.mubr.f32.mxu1 %v2956_v3  ;;  %v175_v9 = vmul.f32 %v3135_v35, %v126_v0 }
0x18d1   :  { %2721 = vmatprep.subr.bf16.mxu1 %v3050_v10 }
0x18d4   :  { %2723 = vmatpush1.bf16.msra.mxu1 %v3067_v15 }
0x18d5   :  { %2725 = vmatprep.subr.bf16.mxu1 %v3071_v16 }
0x18d8   :  { %2727 = vmatpush1.bf16.msra.mxu1 %v3093_v23  ;;  %v176_v23 = vmul.f32 %v3146_v44, %v126_v0 }
0x18d9   :  { %2729 = vmatprep.subr.bf16.mxu1 %v3097_v24 }
0x18dc   :  { %2731 = vmatpush1.bf16.msra.mxu1 %v3110_v28 }
0x18df   :  { %v266_v63 = vpop.permute.xlu1 %265 }
0x18e0   :  { %v315_v1 = vmul.f32 %v3137_v36, %v266_v63  ;;  %v316_v16 = vmul.f32 %v3148_v45, %v266_v63 }
0x18e2   :  { %v347_v2 = vadd.f32 %v315_v1, %v175_v9  ;;  %v348_v24 = vadd.f32 %v316_v16, %v176_v23 }
0x18e4   :  { %v391_v4 = vadd.f32 %v3144_v43, %v347_v2  ;;  %v392_v28 = vadd.f32 %v3153_v54, %v348_v24 }
0x19a2   :  { %v1856_v10 = vpop.f32.mrb[12].mxu1 }
0x19a3   :  { %v1861_v6 = vadd.f32 %v1856_v10, %v391_v4  ;;  %v1858_v15 = vpop.f32.mrb[13].mxu1  ;;  %v196_v4 = vld [vmem:[%s3565_s1 + $0x78] sm:$0xff] }
0x19a4   :  { %v1862_v8 = vadd.f32 %v1858_v15, %v392_v28 }
0x19a5   :  { %v2408_v7 = vmul.f32 -1.442695, %v1861_v6 }
0x19a6   :  { %v2409_v19 = vmul.f32 -1.442695, %v1862_v8 }
0x19a7   :  { %2916 = vpow2.f32 %v2408_v7 }
0x19a8   :  { %2918 = vtanh.f32 %v1862_v8 }
0x19b1   :  { %v2917_v11 = vpop.eup %2916 }
0x19b2   :  { %v1869_v12 = vadd.f32 1.0, %v2917_v11  ;;  %v2919_v13 = vpop.eup %2918 }
0x19b4   :  { %2920 = vrcp.f32 %v1869_v12 }
0x19b5   :  { %2922 = vpow2.f32 %v2409_v19 }
0x19be   :  { %v2921_v14 = vpop.eup %2920 }
0x19bf   :  { %v1877_v17 = vmul.f32 %v2921_v14, %v2919_v13  ;;  %v2923_v20 = vpop.eup %2922  ;;  %v1876_v22 = vmul.f32 %v2921_v14, %v1779_v58 }
0x19c0   :  { %v1870_v21 = vadd.f32 1.0, %v2923_v20 }
0x19c1   :  { %1879 = vrot.lane.b32.xlu0 %v1877_v17, %s2958_s2 }
0x19c2   :  { %2924 = vrcp.f32 %v1870_v21 }
0x19c5   :  { %130 = vperm.xlu0 %2758, %v55_v18  }
0x19cc   :  { %v2925_v27 = vpop.eup %2924 }
0x1a33   :  { %v1880_v25 = vpop.permute.xlu0 %1879 }
0x1a34   :  { %v1882_v26 = vadd.f32 %v1880_v25, %v1876_v22  ;;  %v2959_v22 = vmov 0.0|0.0  }
0x1a35   :  { %2732 = vmatprep.subr.bf16.mxu0 %v2959_v22  ;;  %2744 = vmatprep.subr.bf16.mxu1 %v2959_v22 }
0x1a36   :  { %2926 = vtanh.f32 %v1882_v26 }
0x1a40   :  { %v2927_v29 = vpop.eup %2926 }
0x1a41   :  { %v1884_v30 = vmul.f32 %v2927_v29, %v2925_v27  ;;  %v2095_v29 = vld [vmem:[%s3569_s6 + $0x20] sm:$0xff] }
0x1a43   :  { %1889 = vrot.lane.b32.xlu1 %v1884_v30, %s2958_s2  ;;  %v2096_v30 = vld [vmem:[%s3569_s6 + $0x28] sm:$0xff] }
0x1a44   :  { %v131_v34 = vpop.permute.xlu0 %130 }
0x1a45   :  { %v177_v38 = vmul.f32 %v3135_v35, %v131_v34  ;;  %v178_v49 = vmul.f32 %v3146_v44, %v131_v34 }
0x1a47   :  { %270 = vperm.xlu1 %2759, %v195_v31   ;;  %v2739_v31 = vpack.c.bf16 %v2096_v30, %v2095_v29 }
0x1ab5   :  { %v1890_v32 = vpop.permute.xlu1 %1889 }
0x1ab6   :  { %2410 = vmatmul.mubr.msk.f32.vlgmr.msra.gmra.mrb[14].mxu0 %vm447_vm0, %v1890_v32  ;;  %v2097_v32 = vld [vmem:[%s3569_s6 + $0x30] sm:$0xff] }
0x1ab7   :  { %2455 = vmatprep.mubr.msk.f32.mxu0 %vm2960_vm1, %v2956_v3 }
0x1ac6   :  { %v271_v33 = vpop.permute.xlu1 %270 }
0x1ac7   :  { %v317_v37 = vmul.f32 %v3137_v36, %v271_v33  ;;  %v318_v47 = vmul.f32 %v3148_v45, %v271_v33  ;;  %v2098_v33 = vld [vmem:[%s3569_s6 + $0x38] sm:$0xff] }
0x1ac8   :  { %v2742_v34 = vpack.c.bf16 %v2098_v33, %v2097_v32 }
0x1ac9   :  { %v349_v39 = vadd.f32 %v317_v37, %v177_v38  ;;  %v350_v50 = vadd.f32 %v318_v47, %v178_v49  ;;  %v2183_v47 = vld [vmem:[%s3570_s8 + $0x8] sm:$0xff] }
0x1acb   :  { %v393_v40 = vadd.f32 %v3144_v43, %v349_v39  ;;  %v394_v51 = vadd.f32 %v3153_v54, %v350_v50 }
0x1b89   :  { %v1959_v41 = vpop.f32.mrb[14].mxu0 }
0x1b8a   :  { %v1964_v42 = vadd.f32 %v1959_v41, %v393_v40  ;;  %v1961_v46 = vpop.f32.mrb[15].mxu0 }
0x1b8b   :  { %v1965_v52 = vadd.f32 %v1961_v46, %v394_v51  ;;  %v2182_v46 = vld [vmem:[%s3570_s8] sm:$0xff] }
0x1b8c   :  { %v2411_v48 = vmul.f32 -1.442695, %v1964_v42 }
0x1b8d   :  { %v2412_v60 = vmul.f32 -1.442695, %v1965_v52 }
0x1b8e   :  { %2928 = vpow2.f32 %v2411_v48  ;;  %v2745_v48 = vpack.c.bf16 %v2183_v47, %v2182_v46 }
0x1b8f   :  { %2930 = vtanh.f32 %v1965_v52 }
0x1b98   :  { %v2929_v53 = vpop.eup %2928 }
0x1b99   :  { %v1972_v55 = vadd.f32 1.0, %v2929_v53  ;;  %v2931_v56 = vpop.eup %2930  ;;  %v2184_v53 = vld [vmem:[%s3570_s8 + $0x10] sm:$0xff] }
0x1b9b   :  { %2932 = vrcp.f32 %v1972_v55  ;;  %v2185_v55 = vld [vmem:[%s3570_s8 + $0x18] sm:$0xff] }
0x1b9c   :  { %2934 = vpow2.f32 %v2412_v60 }
0x1ba5   :  { %v2933_v57 = vpop.eup %2932 }
0x1ba6   :  { %v1980_v58 = vmul.f32 %v2933_v57, %v2931_v56  ;;  %v2935_v61 = vpop.eup %2934  ;;  %v1979_v5 = vmul.f32 %v2933_v57, %v1882_v26  ;;  %v2094_v26 = vld [vmem:[%s3569_s6 + $0x18] sm:$0xff]  ;;  %v2748_v56 = vpack.c.bf16 %v2185_v55, %v2184_v53  ;;  %v2416_v57 = vld [vmem:[%s3571_s7] ss:$0 sm:$0xff] }
0x1ba7   :  { %v1973_v62 = vadd.f32 1.0, %v2935_v61 }
0x1ba8   :  { %1982 = vrot.lane.b32.xlu0 %v1980_v58, %s2958_s2 }
0x1ba9   :  { %2936 = vrcp.f32 %v1973_v62  ;;  %v2268_v62 = vld [vmem:[%s3572_s10] sm:$0xff] }
0x1bac   :  { %135 = vperm.xlu0 %2758, %v56_v59  }
0x1bb3   :  { %v2937_v1 = vpop.eup %2936 }
0x1c1a   :  { %v1983_v63 = vpop.permute.xlu0 %1982 }
0x1c1b   :  { %v3482_v0 = vadd.f32 %v1983_v63, %v1979_v5  ;;  %v2269_v5 = vld [vmem:[%s3572_s10 + $0x8] sm:$0xff] }
0x1c1c   :  { %v2751_v63 = vpack.c.bf16 %v2269_v5, %v2268_v62 }
0x1c1d   :  { %2938 = vtanh.f32 %v3482_v0 }
0x1c27   :  { %v2939_v9 = vpop.eup %2938 }
0x1c28   :  { %v1987_v2 = vmul.f32 %v2939_v9, %v2937_v1 }
0x1c2a   :  { %1992 = vrot.lane.b32.xlu1 %v1987_v2, %s2958_s2 }
0x1c2b   :  { %v136_v15 = vpop.permute.xlu0 %135 }
0x1c2c   :  { %v179_v7 = vmul.f32 %v3135_v35, %v136_v15  ;;  %v180_v14 = vmul.f32 %v3146_v44, %v136_v15  ;;  %v2091_v44 = vld [vmem:[%s3569_s6] sm:$0xff] }
0x1c2e   :  { %275 = vperm.xlu1 %2759, %v196_v4  }
0x1c9c   :  { %v1993_v10 = vpop.permute.xlu1 %1992 }
0x1c9d   :  { %2413 = vmatmul.mubr.msk.f32.vlgmr.msra.gmra.mrb[14].mxu1 %vm447_vm0, %v1993_v10 }
0x1c9e   :  { %2466 = vmatprep.mubr.msk.f32.mxu1 %vm2960_vm1, %v2956_v3  ;;  %2746 = vmatpush3.bf16.msra.mxu1 %v2745_v48 }
0x1c9f   :  { %2747 = vmatprep.subr.bf16.mxu1 %v2959_v22 }
0x1ca2   :  { %2749 = vmatpush3.bf16.msra.mxu1 %v2748_v56 }
0x1ca3   :  { %2750 = vmatprep.subr.bf16.mxu1 %v2959_v22 }
0x1cad   :  { %v276_v6 = vpop.permute.xlu1 %275 }
0x1cae   :  { %v319_v16 = vmul.f32 %v3137_v36, %v276_v6  ;;  %v320_v12 = vmul.f32 %v3148_v45, %v276_v6  ;;  %v2092_v45 = vld [vmem:[%s3569_s6 + $0x8] sm:$0xff] }
0x1caf   :  { %v2733_v25 = vpack.c.bf16 %v2092_v45, %v2091_v44 }
0x1cb0   :  { %v351_v23 = vadd.f32 %v319_v16, %v179_v7  ;;  %v352_v17 = vadd.f32 %v320_v12, %v180_v14 }
0x1cb1   :  { %2734 = vmatpush3.bf16.msra.mxu0 %v2733_v25 }
0x1cb2   :  { %v395_v24 = vadd.f32 %v3144_v43, %v351_v23  ;;  %v396_v18 = vadd.f32 %v3153_v54, %v352_v17  ;;  %v2093_v54 = vld [vmem:[%s3569_s6 + $0x10] sm:$0xff]  ;;  %2735 = vmatprep.subr.bf16.mxu0 %v2959_v22 }
0x1cb3   :  { %v2736_v27 = vpack.c.bf16 %v2094_v26, %v2093_v54 }
0x1cb5   :  { %2737 = vmatpush3.bf16.msra.mxu0 %v2736_v27 }
0x1cb6   :  { %2738 = vmatprep.subr.bf16.mxu0 %v2959_v22 }
0x1cb9   :  { %2740 = vmatpush3.bf16.msra.mxu0 %v2739_v31 }
0x1cba   :  { %2741 = vmatprep.subr.bf16.mxu0 %v2959_v22 }
0x1cbd   :  { %2743 = vmatpush3.bf16.msra.mxu0 %v2742_v34 }
0x1d70   :  { %v2062_v28 = vpop.f32.mrb[14].mxu1 }
0x1d71   :  { %v2067_v8 = vadd.f32 %v2062_v28, %v395_v24  ;;  %v2064_v11 = vpop.f32.mrb[15].mxu1 }
0x1d72   :  { %v2068_v19 = vadd.f32 %v2064_v11, %v396_v18 }
0x1d73   :  { %v2414_v13 = vmul.f32 -1.442695, %v2067_v8 }
0x1d74   :  { %v2415_v37 = vmul.f32 -1.442695, %v2068_v19 }
0x1d75   :  { %2940 = vpow2.f32 %v2414_v13 }
0x1d76   :  { %2942 = vtanh.f32 %v2068_v19 }
0x1d7f   :  { %v2941_v20 = vpop.eup %2940 }
0x1d80   :  { %v2075_v36 = vadd.f32 1.0, %v2941_v20  ;;  %v2943_v35 = vpop.eup %2942 }
0x1d82   :  { %2944 = vrcp.f32 %v2075_v36 }
0x1d83   :  { %2946 = vpow2.f32 %v2415_v37 }
0x1d8c   :  { %v2945_v21 = vpop.eup %2944 }
0x1d8d   :  { %v2083_v43 = vmul.f32 %v2945_v21, %v2943_v35  ;;  %v2947_v38 = vpop.eup %2946  ;;  %v2082_v40 = vmul.f32 %v2945_v21, %v3482_v0  ;;  %v2418_v0 = vld [vmem:[%s3573_s9] ss:$0 sm:$0xff] }
0x1d8e   :  { %v2076_v39 = vadd.f32 1.0, %v2947_v38 }
0x1d8f   :  { %2085 = vrot.lane.b32.xlu0 %v2083_v43, %s2958_s2 }
0x1d90   :  { %2948 = vrcp.f32 %v2076_v39 }
0x1d9a   :  { %v2949_v49 = vpop.eup %2948 }
0x1e01   :  { %v2086_v41 = vpop.permute.xlu0 %2085 }
0x1e02   :  { %v2088_v42 = vadd.f32 %v2086_v41, %v2082_v40 }
0x1e04   :  { %2950 = vtanh.f32 %v2088_v42 }
0x1e0e   :  { %v2951_v50 = vpop.eup %2950 }
0x1e0f   :  { %v2090_v51 = vmul.f32 %v2951_v50, %v2949_v49 }
0x1e11   :  { %2107 = vrot.lane.b32.xlu1 %v2090_v51, %s2958_s2 }
0x1e83   :  { %v2108_v52 = vpop.permute.xlu1 %2107 }
0x1e84   :  { %2456 = vmatmul.mubr.msk.f32.vlgmr.msra.gmra.mrb[16].mxu0 %vm447_vm0, %v2108_v52 }
0x1f57   :  { %v2177_v58 = vpop.f32.mrb[16].mxu0 }
0x1f58   :  { %v2178_v59 = vadd.f32 %v2416_v57, %v2177_v58  ;;  %v2457_v60 = vpop.f32.mrb[17].mxu0 }
0x1f5a   :  { %v2181_v61 = vmax.f32 %v2178_v59, 0.0 }
0x1f5c   :  { %2467 = vmatmul.mubr.msk.f32.vlgmr.msra.gmra.mrb[16].mxu1 %vm2193_vm2, %v2181_v61 }
0x1f5d   :  { %2473 = vmatprep.mubr.msk.f32.mxu1 %vm2960_vm1, %v2956_v3  ;;  %2752 = vmatpush3.bf16.msra.mxu1 %v2751_v63  ;;  %v2420_v3 = vld [vmem:[%s3574_s11] ss:$0 sm:$0xff] }
0x202f   :  { %v2263_v1 = vpop.f32.mrb[16].mxu1 }
0x2030   :  { %v2264_v9 = vadd.f32 %v2418_v0, %v2263_v1  ;;  %v2468_v2 = vpop.f32.mrb[17].mxu1 }
0x2032   :  { %v2267_v4 = vmax.f32 %v2264_v9, 0.0 }
0x2034   :  { %2474 = vmatmul.mubr.msk.f32.vlgmr.msra.gmra.mrb[18].mxu1 %vm2277_vm3, %v2267_v4 }
0x2107   :  { %v2347_v10 = vpop.f32.mrb[18].mxu1 }
0x2108   :  { %v2348_v6 = vadd.f32 %v2420_v3, %v2347_v10  ;;  %v2475_v15 = vpop.f32.mrb[19].mxu1 }
0x210a   :  { %v2352_v16 = vsel %vm2351_vm4, %v2348_v6, -inf }
0x210b   :  { %2353 = vmax.xlane.f32.xlu0 %v2352_v16 }
0x2198   :  { %v2354_v7 = vpop.xlane.xlu0 %2353 }
0x2199   :  { %v2355_v23 = vsub.f32 %v2348_v6, %v2354_v7 }
0x219b   :  { %v2356_v24 = vmul.f32 1.442695, %v2355_v23 }
0x219d   :  { %2952 = vpow2.f32 %v2356_v24 }
0x21a7   :  { %v2953_v28 = vpop.eup %2952 }
0x21a8   :  { %v2358_v8 = vsel %vm2351_vm4, %v2953_v28, 0.0 }
0x21a9   :  { %2359 = vadd.xlane.f32.xlu1 %v2358_v8 }
0x2236   :  { %v2360_v11 = vpop.xlane.xlu1 %2359 }
0x2237   :  { %2954 = vlog2.f32 %v2360_v11 }
0x2241   :  { %v2955_v12 = vpop.eup %2954 }
0x2242   :  { %v2362_v13 = vmul.f32 0.6931472, %v2955_v12 }
0x2244   :  { %v2363_v14 = vsub.f32 %v2355_v23, %v2362_v13 }
0x2246   :  { %2364 = vst.msk [vmem:[%s3575_s12] sm:$0xff] %vm2351_vm4, %v2363_v14 }

</bundles_post_ra>
